<compile_context>
chip_gen: v5e
topology: v5e:2x2
jax: 0.10.0
libtpu: 0.0.40
codegen_flags: <defaults>
</compile_context>

<pallas_src>
import jax
import jax.numpy as jnp
from jax.experimental import pallas as pl
from jax.experimental.pallas import tpu as pltpu


def vae_fwd_kernel(
    x_ref,                      # [TB, D_in]         f32 (cast to bf16 in-kernel)
    eps_ref,                    # [TB, N_LAT]        f32
    w_enc_ref, b_enc_ref,       # [D_in, N_ENC] bf16, [1, N_ENC] f32
    w_heads_ref, b_heads_ref,   # [N_ENC, 2*N_LAT] bf16, [1, 2*N_LAT] f32 (mu | logvar fused)
    w_dec_ref, b_dec_ref,       # [N_LAT, N_ENC] bf16, [1, N_ENC] f32
    w_out_ref, b_out_ref,       # [N_ENC, D_in] bf16, [1, D_in] f32
    out_ref,                    # [TB, D_in + 2*N_LAT] f32  (x_hat | mu | logvar)
):
    n_lat = eps_ref.shape[-1]

    # encoder: ReLU(x @ W_enc + b_enc) — bf16 MXU operands, f32 accumulate/elementwise
    x = x_ref[...].astype(jnp.bfloat16)           # cast on VPU (idle slack), not in wrapper
    enc = jnp.dot(x, w_enc_ref[...], preferred_element_type=jnp.float32)
    enc = jnp.maximum(enc + b_enc_ref[...], 0.0)

    # fused mu/logvar heads: one [N_ENC, 2*N_LAT] matmul instead of two N=N_LAT dots
    mulv = jnp.dot(enc.astype(jnp.bfloat16), w_heads_ref[...],
                   preferred_element_type=jnp.float32) + b_heads_ref[...]
    mu = mulv[:, :n_lat]
    logvar = mulv[:, n_lat:]

    # reparameterize (f32 on VPU/EUP): z = mu + eps * exp(0.5 * logvar)
    z = mu + eps_ref[...] * jnp.exp(0.5 * logvar)

    # dec Linear back to N_ENC, then decoder Linear back to input dim
    h = jnp.dot(z.astype(jnp.bfloat16), w_dec_ref[...],
                preferred_element_type=jnp.float32) + b_dec_ref[...]
    xhat = jnp.dot(h.astype(jnp.bfloat16), w_out_ref[...],
                   preferred_element_type=jnp.float32) + b_out_ref[...]

    # Single lane-dense store: concat in-register (XLU lane shuffle, free slack)
    # then one full-width unmasked write of the [TB, D_in + 2*N_LAT] slab.
    out_ref[...] = jnp.concatenate([xhat, mulv], axis=-1)


def vae_forward(x, params, eps, *, tb=512, buffer_count=2):
    """Fused VAE forward.  x: [B, D_in] f32, eps: [B, N_LAT] f32.
    Returns (x_hat, mu, logvar), all f32."""
    B, D_in = x.shape
    n_lat = eps.shape[1]
    n_out = D_in + 2 * n_lat            # fused output lane width (128 at default sizes)

    tb = min(tb, B)
    # pad batch only if needed (main() picks B % tb == 0, so this is a no-op there)
    B_pad = pl.cdiv(B, tb) * tb
    if B_pad != B:
        x = jnp.pad(x, ((0, B_pad - B), (0, 0)))
        eps = jnp.pad(eps, ((0, B_pad - B), (0, 0)))

    grid = (B_pad // tb,)

    def tiled(shape):                   # batch-tiled arrays (double-buffered DMA)
        if buffer_count == 2:
            return pl.BlockSpec(shape, lambda i: (i, 0))
        # optional deeper pipelining knob (review: sweep Buffered(3) once TB is large)
        return pl.BlockSpec(shape, lambda i: (i, 0),
                            pipeline_mode=pl.Buffered(buffer_count))

    def resident(arr):                  # weights/biases stay put in VMEM
        return pl.BlockSpec(arr.shape, lambda i: (0, 0))

    in_specs = [
        tiled((tb, D_in)),              # x (f32; cast to bf16 in-kernel)
        tiled((tb, n_lat)),             # eps
        resident(params["w_enc"]), resident(params["b_enc"]),
        resident(params["w_heads"]), resident(params["b_heads"]),
        resident(params["w_dec"]), resident(params["b_dec"]),
        resident(params["w_out"]), resident(params["b_out"]),
    ]
    out_specs = tiled((tb, n_out))      # fused lane-dense slab: x_hat | mu | logvar

    fused = pl.pallas_call(
        vae_fwd_kernel,
        grid=grid,
        in_specs=in_specs,
        out_specs=out_specs,
        out_shape=jax.ShapeDtypeStruct((B_pad, n_out), jnp.float32),
        compiler_params=pltpu.CompilerParams(
            dimension_semantics=("parallel",),      # batch tiles -> 2nd TC on v7x
            vmem_limit_bytes=32 * 1024 * 1024,      # sizes here use < 1 MiB; safe on all gens
        ),
    )(x, eps,
      params["w_enc"], params["b_enc"],
      params["w_heads"], params["b_heads"],
      params["w_dec"], params["b_dec"],
      params["w_out"], params["b_out"])

    # TODO(synk): a fused loss could consume `fused[:B]` directly and skip these slices.
    x_hat = fused[:B, :D_in]
    mu = fused[:B, D_in:D_in + n_lat]
    logvar = fused[:B, D_in + n_lat:]
    return x_hat, mu, logvar


def init_params(key, d_in, n_out_enc, n_latent):
    """Deterministic synthetic weights, pre-transposed to [in, out].
    Weights are stored bf16 (MXU operands); biases stay f32 (elementwise)."""
    ks = jax.random.split(key, 10)

    def lin(kw, kb, fan_in, fan_out):
        scale = 1.0 / jnp.sqrt(fan_in)
        w = jax.random.uniform(kw, (fan_in, fan_out), jnp.float32, -scale, scale)
        b = jax.random.uniform(kb, (1, fan_out), jnp.float32, -scale, scale)
        return w.astype(jnp.bfloat16), b

    w_enc, b_enc = lin(ks[0], ks[1], d_in, n_out_enc)
    w_mu,  b_mu  = lin(ks[2], ks[3], n_out_enc, n_latent)
    w_lv,  b_lv  = lin(ks[4], ks[5], n_out_enc, n_latent)
    w_dec, b_dec = lin(ks[6], ks[7], n_latent, n_out_enc)
    w_out, b_out = lin(ks[8], ks[9], n_out_enc, d_in)

    # fuse the mu / logvar heads into one matmul (done once on the host)
    w_heads = jnp.concatenate([w_mu, w_lv], axis=1)        # [N_ENC, 2*N_LAT] bf16
    b_heads = jnp.concatenate([b_mu, b_lv], axis=1)        # [1, 2*N_LAT] f32
    return dict(
        w_enc=w_enc, b_enc=b_enc,
        w_heads=w_heads, b_heads=b_heads,
        w_dec=w_dec, b_dec=b_dec,
        w_out=w_out, b_out=b_out,
    )


def vae_forward_ref(x, p, eps):
    """Pure-JAX reference with identical bf16-matmul / f32-elementwise math."""
    n_lat = eps.shape[1]
    xb = x.astype(jnp.bfloat16)
    enc = jnp.maximum(
        jnp.dot(xb, p["w_enc"], preferred_element_type=jnp.float32) + p["b_enc"], 0.0)
    mulv = jnp.dot(enc.astype(jnp.bfloat16), p["w_heads"],
                   preferred_element_type=jnp.float32) + p["b_heads"]
    mu, logvar = mulv[:, :n_lat], mulv[:, n_lat:]
    z = mu + eps * jnp.exp(0.5 * logvar)
    h = jnp.dot(z.astype(jnp.bfloat16), p["w_dec"],
                preferred_element_type=jnp.float32) + p["b_dec"]
    x_hat = jnp.dot(h.astype(jnp.bfloat16), p["w_out"],
                    preferred_element_type=jnp.float32) + p["b_out"]
    return x_hat, mu, logvar


if __name__ == "__main__":
    # D_in + 2*N_LAT = 128 -> lane-dense fused output; TB=512 (multiple of 256),
    # grid of 2 batch tiles so both v7x TensorCores get work; B % TB == 0 (no pad copy).
    B, D_IN, N_OUT_ENC, N_LATENT, TB = 1024, 64, 128, 32, 512

    key = jax.random.PRNGKey(0)
    k_x, k_eps, k_p = jax.random.split(key, 3)

    x = jax.random.normal(k_x, (B, D_IN), jnp.float32)
    eps = jax.random.normal(k_eps, (B, N_LATENT), jnp.float32)
    params = init_params(k_p, D_IN, N_OUT_ENC, N_LATENT)

    x_hat, mu, logvar = jax.block_until_ready(vae_forward(x, params, eps, tb=TB))

    # sanity check against pure-JAX reference (same bf16 matmul precision)
    x_hat_r, mu_r, lv_r = vae_forward_ref(x, params, eps)
    assert jnp.allclose(x_hat, x_hat_r, atol=1e-2, rtol=1e-2)
    assert jnp.allclose(mu, mu_r, atol=1e-2, rtol=1e-2)
    assert jnp.allclose(logvar, lv_r, atol=1e-2, rtol=1e-2)

    print("KERNEL_OK")
</pallas_src>

<mosaic_0001>
module attributes {stable_mosaic.version = 11 : i64} {
  func.func @vae_fwd_kernel(%arg0: i32, %arg1: memref<512x64xf32, #tpu.memory_space<vmem>>, %arg2: memref<512x32xf32, #tpu.memory_space<vmem>>, %arg3: memref<64x128xbf16, #tpu.memory_space<vmem>>, %arg4: memref<1x128xf32, #tpu.memory_space<vmem>>, %arg5: memref<128x64xbf16, #tpu.memory_space<vmem>>, %arg6: memref<1x64xf32, #tpu.memory_space<vmem>>, %arg7: memref<32x128xbf16, #tpu.memory_space<vmem>>, %arg8: memref<1x128xf32, #tpu.memory_space<vmem>>, %arg9: memref<128x64xbf16, #tpu.memory_space<vmem>>, %arg10: memref<1x64xf32, #tpu.memory_space<vmem>>, %arg11: memref<512x128xf32, #tpu.memory_space<vmem>>) attributes {dimension_semantics = [#tpu.dimension_semantics<parallel>], iteration_bounds = array<i64: 2>, scalar_prefetch = 0 : i64, scratch_operands = 0 : i64, tpu.core_type = #tpu.core_type<tc>, window_params = [{transform_indices = @transform_0, window_bounds = array<i64: 512, 64>}, {transform_indices = @transform_1, window_bounds = array<i64: 512, 32>}, {pipeline_mode = #tpu.pipeline_mode<synchronous>, transform_indices = @transform_2, window_bounds = array<i64: 64, 128>}, {pipeline_mode = #tpu.pipeline_mode<synchronous>, transform_indices = @transform_3, window_bounds = array<i64: 1, 128>}, {pipeline_mode = #tpu.pipeline_mode<synchronous>, transform_indices = @transform_4, window_bounds = array<i64: 128, 64>}, {pipeline_mode = #tpu.pipeline_mode<synchronous>, transform_indices = @transform_5, window_bounds = array<i64: 1, 64>}, {pipeline_mode = #tpu.pipeline_mode<synchronous>, transform_indices = @transform_6, window_bounds = array<i64: 32, 128>}, {pipeline_mode = #tpu.pipeline_mode<synchronous>, transform_indices = @transform_7, window_bounds = array<i64: 1, 128>}, {pipeline_mode = #tpu.pipeline_mode<synchronous>, transform_indices = @transform_8, window_bounds = array<i64: 128, 64>}, {pipeline_mode = #tpu.pipeline_mode<synchronous>, transform_indices = @transform_9, window_bounds = array<i64: 1, 64>}, {transform_indices = @transform_10, window_bounds = array<i64: 512, 128>}]} {
    %c0 = arith.constant 0 : index
    %c0_0 = arith.constant 0 : index
    %0 = vector.load %arg1[%c0, %c0_0] : memref<512x64xf32, #tpu.memory_space<vmem>>, vector<512x64xf32>
    %1 = arith.truncf %0 : vector<512x64xf32> to vector<512x64xbf16>
    %c0_1 = arith.constant 0 : index
    %c0_2 = arith.constant 0 : index
    %2 = vector.load %arg3[%c0_1, %c0_2] : memref<64x128xbf16, #tpu.memory_space<vmem>>, vector<64x128xbf16>
    %cst = arith.constant dense<0.000000e+00> : vector<512x128xf32>
    %3 = tpu.matmul %1, %2, %cst {dimension_numbers = #tpu.dot_dimension_numbers<[1], [0], [0], [1], [0, 0, 1, 1], [], []>} : vector<512x64xbf16>, vector<64x128xbf16>, vector<512x128xf32> -> vector<512x128xf32>
    %c0_3 = arith.constant 0 : index
    %c0_4 = arith.constant 0 : index
    %4 = vector.load %arg4[%c0_3, %c0_4] : memref<1x128xf32, #tpu.memory_space<vmem>>, vector<1x128xf32>
    %5 = vector.broadcast %4 : vector<1x128xf32> to vector<512x128xf32>
    %6 = arith.addf %3, %5 : vector<512x128xf32>
    %cst_5 = arith.constant 0.000000e+00 : f32
    %7 = vector.broadcast %cst_5 : f32 to vector<512x128xf32>
    %8 = arith.maximumf %6, %7 : vector<512x128xf32>
    %9 = arith.truncf %8 : vector<512x128xf32> to vector<512x128xbf16>
    %c0_6 = arith.constant 0 : index
    %c0_7 = arith.constant 0 : index
    %10 = vector.load %arg5[%c0_6, %c0_7] : memref<128x64xbf16, #tpu.memory_space<vmem>>, vector<128x64xbf16>
    %cst_8 = arith.constant dense<0.000000e+00> : vector<512x64xf32>
    %11 = tpu.matmul %9, %10, %cst_8 {dimension_numbers = #tpu.dot_dimension_numbers<[1], [0], [0], [1], [0, 0, 1, 1], [], []>} : vector<512x128xbf16>, vector<128x64xbf16>, vector<512x64xf32> -> vector<512x64xf32>
    %c0_9 = arith.constant 0 : index
    %c0_10 = arith.constant 0 : index
    %12 = vector.load %arg6[%c0_9, %c0_10] : memref<1x64xf32, #tpu.memory_space<vmem>>, vector<1x64xf32>
    %13 = vector.broadcast %12 : vector<1x64xf32> to vector<512x64xf32>
    %14 = arith.addf %11, %13 : vector<512x64xf32>
    %15 = vector.extract_strided_slice %14 {offsets = [0, 0], sizes = [512, 32], strides = [1, 1]} : vector<512x64xf32> to vector<512x32xf32>
    %16 = vector.extract_strided_slice %14 {offsets = [0, 32], sizes = [512, 32], strides = [1, 1]} : vector<512x64xf32> to vector<512x32xf32>
    %c0_11 = arith.constant 0 : index
    %c0_12 = arith.constant 0 : index
    %17 = vector.load %arg2[%c0_11, %c0_12] : memref<512x32xf32, #tpu.memory_space<vmem>>, vector<512x32xf32>
    %cst_13 = arith.constant 5.000000e-01 : f32
    %18 = vector.broadcast %cst_13 : f32 to vector<512x32xf32>
    %19 = arith.mulf %18, %16 : vector<512x32xf32>
    %20 = math.exp %19 : vector<512x32xf32>
    %21 = arith.mulf %17, %20 : vector<512x32xf32>
    %22 = arith.addf %15, %21 : vector<512x32xf32>
    %23 = arith.truncf %22 : vector<512x32xf32> to vector<512x32xbf16>
    %c0_14 = arith.constant 0 : index
    %c0_15 = arith.constant 0 : index
    %24 = vector.load %arg7[%c0_14, %c0_15] : memref<32x128xbf16, #tpu.memory_space<vmem>>, vector<32x128xbf16>
    %cst_16 = arith.constant dense<0.000000e+00> : vector<512x128xf32>
    %25 = tpu.matmul %23, %24, %cst_16 {dimension_numbers = #tpu.dot_dimension_numbers<[1], [0], [0], [1], [0, 0, 1, 1], [], []>} : vector<512x32xbf16>, vector<32x128xbf16>, vector<512x128xf32> -> vector<512x128xf32>
    %c0_17 = arith.constant 0 : index
    %c0_18 = arith.constant 0 : index
    %26 = vector.load %arg8[%c0_17, %c0_18] : memref<1x128xf32, #tpu.memory_space<vmem>>, vector<1x128xf32>
    %27 = vector.broadcast %26 : vector<1x128xf32> to vector<512x128xf32>
    %28 = arith.addf %25, %27 : vector<512x128xf32>
    %29 = arith.truncf %28 : vector<512x128xf32> to vector<512x128xbf16>
    %c0_19 = arith.constant 0 : index
    %c0_20 = arith.constant 0 : index
    %30 = vector.load %arg9[%c0_19, %c0_20] : memref<128x64xbf16, #tpu.memory_space<vmem>>, vector<128x64xbf16>
    %cst_21 = arith.constant dense<0.000000e+00> : vector<512x64xf32>
    %31 = tpu.matmul %29, %30, %cst_21 {dimension_numbers = #tpu.dot_dimension_numbers<[1], [0], [0], [1], [0, 0, 1, 1], [], []>} : vector<512x128xbf16>, vector<128x64xbf16>, vector<512x64xf32> -> vector<512x64xf32>
    %c0_22 = arith.constant 0 : index
    %c0_23 = arith.constant 0 : index
    %32 = vector.load %arg10[%c0_22, %c0_23] : memref<1x64xf32, #tpu.memory_space<vmem>>, vector<1x64xf32>
    %33 = vector.broadcast %32 : vector<1x64xf32> to vector<512x64xf32>
    %34 = arith.addf %31, %33 : vector<512x64xf32>
    %35 = tpu.concatenate %34, %14 in 1 : vector<512x64xf32>, vector<512x64xf32> -> vector<512x128xf32>
    %c0_24 = arith.constant 0 : index
    %c0_25 = arith.constant 0 : index
    %36 = vector.load %arg11[%c0_24, %c0_25] : memref<512x128xf32, #tpu.memory_space<vmem>>, vector<512x128xf32>
    tpu.vector_store %arg11[%c0_24, %c0_25], %35 {strides = array<i32>} : memref<512x128xf32, #tpu.memory_space<vmem>>, vector<512x128xf32>,
    return
  }
  func.func @transform_0(%arg0: i32) -> (i32, i32) {
    %c0_i32 = arith.constant 0 : i32
    %c0_i32_0 = arith.constant 0 : i32
    return %arg0, %c0_i32 : i32, i32
  }
  func.func @transform_1(%arg0: i32) -> (i32, i32) {
    %c0_i32 = arith.constant 0 : i32
    %c0_i32_0 = arith.constant 0 : i32
    return %arg0, %c0_i32 : i32, i32
  }
  func.func @transform_2(%arg0: i32) -> (i32, i32) {
    %c0_i32 = arith.constant 0 : i32
    %c0_i32_0 = arith.constant 0 : i32
    %c0_i32_1 = arith.constant 0 : i32
    return %c0_i32, %c0_i32_0 : i32, i32
  }
  func.func @transform_3(%arg0: i32) -> (i32, i32) {
    %c0_i32 = arith.constant 0 : i32
    %c0_i32_0 = arith.constant 0 : i32
    %c0_i32_1 = arith.constant 0 : i32
    return %c0_i32, %c0_i32_0 : i32, i32
  }
  func.func @transform_4(%arg0: i32) -> (i32, i32) {
    %c0_i32 = arith.constant 0 : i32
    %c0_i32_0 = arith.constant 0 : i32
    %c0_i32_1 = arith.constant 0 : i32
    return %c0_i32, %c0_i32_0 : i32, i32
  }
  func.func @transform_5(%arg0: i32) -> (i32, i32) {
    %c0_i32 = arith.constant 0 : i32
    %c0_i32_0 = arith.constant 0 : i32
    %c0_i32_1 = arith.constant 0 : i32
    return %c0_i32, %c0_i32_0 : i32, i32
  }
  func.func @transform_6(%arg0: i32) -> (i32, i32) {
    %c0_i32 = arith.constant 0 : i32
    %c0_i32_0 = arith.constant 0 : i32
    %c0_i32_1 = arith.constant 0 : i32
    return %c0_i32, %c0_i32_0 : i32, i32
  }
  func.func @transform_7(%arg0: i32) -> (i32, i32) {
    %c0_i32 = arith.constant 0 : i32
    %c0_i32_0 = arith.constant 0 : i32
    %c0_i32_1 = arith.constant 0 : i32
    return %c0_i32, %c0_i32_0 : i32, i32
  }
  func.func @transform_8(%arg0: i32) -> (i32, i32) {
    %c0_i32 = arith.constant 0 : i32
    %c0_i32_0 = arith.constant 0 : i32
    %c0_i32_1 = arith.constant 0 : i32
    return %c0_i32, %c0_i32_0 : i32, i32
  }
  func.func @transform_9(%arg0: i32) -> (i32, i32) {
    %c0_i32 = arith.constant 0 : i32
    %c0_i32_0 = arith.constant 0 : i32
    %c0_i32_1 = arith.constant 0 : i32
    return %c0_i32, %c0_i32_0 : i32, i32
  }
  func.func @transform_10(%arg0: i32) -> (i32, i32) {
    %c0_i32 = arith.constant 0 : i32
    %c0_i32_0 = arith.constant 0 : i32
    return %arg0, %c0_i32 : i32, i32
  }
}

</mosaic_0001>

<bundles_post_ra>
// kernel: tpu_custom_call.1
= control target key start
LH: loop header
LB: loop body
LE: loop exit
PB: predicated region body
PF: predicated region fallthrough
CT: control target
= control target key end

     0   :  { %15 = vsyncpa [#allocation3], 0  ;;  %s4637_s0 = inlined_call_operand.vmem [shape: f32[1024,64], index: 0, kind: input, shape index: {}]   ;;  %s4638_s1 = inlined_call_operand.vmem [shape: f32[1024,32], index: 1, kind: input, shape index: {}]   ;;  %s4639_s2 = inlined_call_operand.vmem [shape: bf16[64,128], index: 2, kind: input, shape index: {}]   ;;  %s4640_s3 = inlined_call_operand.vmem [shape: f32[1,128], index: 3, kind: input, shape index: {}]   ;;  %s4641_s4 = inlined_call_operand.vmem [shape: bf16[128,64], index: 4, kind: input, shape index: {}]   ;;  %s4642_s5 = inlined_call_operand.vmem [shape: f32[1,64], index: 5, kind: input, shape index: {}]   ;;  %s4643_s6 = inlined_call_operand.vmem [shape: bf16[32,128], index: 6, kind: input, shape index: {}]   ;;  %s4644_s7 = inlined_call_operand.vmem [shape: f32[1,128], index: 7, kind: input, shape index: {}]   ;;  %s4645_s8 = inlined_call_operand.vmem [shape: bf16[128,64], index: 8, kind: input, shape index: {}]   ;;  %s4646_s9 = inlined_call_operand.vmem [shape: f32[1,64], index: 9, kind: input, shape index: {}]   ;;  %s4647_s10 = inlined_call_operand.hbm [shape: f32[1024,128], index: 10, kind: output, shape index: {}]  }
   0x1   :  { %17 = vsyncpa [#allocation3 + $0x1], 0  ;;  %s3307_s13 = smov 0   ;;  %s3309_s14 = smov 0  }
   0x2   :  { %s3311_s15 = smov 0   ;;  %s3313_s16 = smov 0  }
   0x3 LB: > { %s3328_s17 = sadd.s32 4294967295, %s3246_s16   ;;  %s2816_s18 = sadd.s32 4294967294, %s3246_s16   ;;  %s3246_s16 = sphi %s3313_s16, %s4730_s16   ;;  %s3242_s15 = sphi %s3311_s15, %s4729_s15   ;;  %s3238_s14 = sphi %s3309_s14, %s4728_s14   ;;  %s3234_s13 = sphi %s3307_s13, %s4727_s13  }
   0x4   : > { %s3332_s19 = sadd.s32 1, %s3246_s16   ;;  %s250_s20 = sadd.s32 1, %s3242_s15 }
   0x5   : > { %s247_s21 = ssub.s32 %s3246_s16, %s3332_s19  ;;  %p260_p0 = scmp.ne.s32.totalorder %s3242_s15, %s3238_s14 }
   0x6   : > { %p248_p1 = scmp.eq.s32.totalorder %s247_s21, 0  ;;  %p261_p2 = scmp.eq.s32.totalorder %s3328_s17, 1 }
   0x7   : > { %p266_p3 = scmp.ne.s32.totalorder %s3238_s14, %s3234_s13  ;;  %p267_p4 = scmp.eq.s32.totalorder %s2816_s18, 1 }
   0x8   : > { %s3343_s22 = scalar_select %p248_p1, %s3242_s15, %s250_s20  }
   0x9   : > { %p3345_p5 = por %p261_p2, %p260_p0  ;;  %p3349_p6 = por %p267_p4, %p266_p3 }
   0xa   : > { %p2819_p7 = scmp.ge.s32.totalorder %s3246_s16, 1  ;;  %p327_p8 = scmp.lt.s32.totalorder %s3246_s16, 3 }
   0xc   : > { %p328_p9 = pnand %p2819_p7, %p327_p8 }
   0xe   : > { %331 = sbr.rel (%p328_p9) target bundleno = 1231 (0x4cf), region = 60 }
  0x13   : > { %v2985_v0 = vld [vmem:[%s4639_s2 + $0x18] sm:$0xff]  ;;  %s2821_s27 = sshll.u32 %s3328_s17, 6  ;;  %v2984_v1 = vld [vmem:[%s4639_s2 + $0x10] sm:$0xff]  ;;  %v2983_v2 = vld [vmem:[%s4639_s2 + $0x8] sm:$0xff]  ;;  %vm516_vm0 = vcmask 523264   ;;  %s3248_s18 = smov 96  }
  0x14   : > { %p371_p10 = scmp.lt.s32.totalorder %s2821_s27, 127  ;;  %617 = vmatpush.bf16.msra.mxu0 %v2985_v0  ;;  %v2982_v3 = vld [vmem:[%s4639_s2] sm:$0xff]  ;;  %v2993_v19 = vld [vmem:[%s4641_s4 + $0x38] sm:$0xff]  ;;  %v2992_v23 = vld [vmem:[%s4641_s4 + $0x30] sm:$0xff]  ;;  %vm1807_vm1 = vcmask 261120   ;;  %s3204_s26 = scalar_lea.hbm %s4647_s10, 1024 }
  0x15   : > { %946 = vmatpush.bf16.msra.mxu1 %v2993_v19  ;;  %v2991_v24 = vld [vmem:[%s4641_s4 + $0x28] sm:$0xff]  ;;  %v2990_v25 = vld [vmem:[%s4641_s4 + $0x20] sm:$0xff]  ;;  %v2989_v28 = vld [vmem:[%s4641_s4 + $0x18] sm:$0xff] }
  0x16   : > { %s4732_s27 = smov (!%p371_p10, %s2821_s27), 127  ;;  %v2988_v30 = vld [vmem:[%s4641_s4 + $0x10] sm:$0xff]  ;;  %v2987_v31 = vld [vmem:[%s4641_s4 + $0x8] sm:$0xff]  ;;  %v2986_v32 = vld [vmem:[%s4641_s4] sm:$0xff] }
  0x17   : > { %s2822_s30 = sshll.u32 %s4732_s27, 3  ;;  %v3431_v40 = vld [vmem:[%s4640_s3] ss:$0 sm:$0xff] }
  0x18   : > { %618 = vmatpush.bf16.msra.mxu0 %v2984_v1  ;;  %s3373_s21 = scalar_lea.vmem %s4637_s0, %s2822_s30  ;;  %s3616_s12 = scalar_lea.vmem %s4638_s1, %s2822_s30 }
  0x19   : > { %v384_v4 = vld [vmem:[%s3373_s21] sm:$0xff]  ;;  %v385_v5 = vld [vmem:[%s3373_s21 + $0x8] sm:$0xff]  ;;  %v386_v7 = vld [vmem:[%s3373_s21 + $0x10] sm:$0xff]  ;;  %947 = vmatpush.bf16.msra.mxu1 %v2992_v23 }
  0x1a   : > { %v448_v6 = vpack.c.bf16 %v385_v5, %v384_v4  ;;  %v387_v8 = vld [vmem:[%s3373_s21 + $0x18] sm:$0xff]  ;;  %v388_v10 = vld [vmem:[%s3373_s21 + $0x20] sm:$0xff]  ;;  %v389_v11 = vld [vmem:[%s3373_s21 + $0x28] sm:$0xff] }
  0x1b   : > { %v449_v9 = vpack.c.bf16 %v387_v8, %v386_v7  ;;  %v450_v12 = vpack.c.bf16 %v389_v11, %v388_v10  ;;  %v390_v13 = vld [vmem:[%s3373_s21 + $0x30] sm:$0xff]  ;;  %v391_v14 = vld [vmem:[%s3373_s21 + $0x38] sm:$0xff]  ;;  %v392_v16 = vld [vmem:[%s3373_s21 + $0x40] sm:$0xff] }
  0x1c   : > { %619 = vmatpush.bf16.msra.mxu0 %v2983_v2  ;;  %v451_v15 = vpack.c.bf16 %v391_v14, %v390_v13  ;;  %v393_v17 = vld [vmem:[%s3373_s21 + $0x48] sm:$0xff]  ;;  %v394_v20 = vld [vmem:[%s3373_s21 + $0x50] sm:$0xff]  ;;  %v395_v21 = vld [vmem:[%s3373_s21 + $0x58] sm:$0xff] }
  0x1d   : > { %v452_v18 = vpack.c.bf16 %v393_v17, %v392_v16  ;;  %v453_v22 = vpack.c.bf16 %v395_v21, %v394_v20  ;;  %948 = vmatpush.bf16.msra.mxu1 %v2991_v24  ;;  %v396_v26 = vld [vmem:[%s3373_s21 + $0x60] sm:$0xff]  ;;  %v397_v27 = vld [vmem:[%s3373_s21 + $0x68] sm:$0xff]  ;;  %v398_v33 = vld [vmem:[%s3373_s21 + $0x70] sm:$0xff] }
  0x1e   : > { %v454_v29 = vpack.c.bf16 %v397_v27, %v396_v26  ;;  %v399_v34 = vld [vmem:[%s3373_s21 + $0x78] sm:$0xff]  ;;  %v400_v36 = vld [vmem:[%s3373_s21 + $0x80] sm:$0xff]  ;;  %v401_v37 = vld [vmem:[%s3373_s21 + $0x88] sm:$0xff] }
  0x1f   : > { %v455_v35 = vpack.c.bf16 %v399_v34, %v398_v33  ;;  %v456_v38 = vpack.c.bf16 %v401_v37, %v400_v36  ;;  %v402_v46 = vld [vmem:[%s3373_s21 + $0x90] sm:$0xff]  ;;  %v403_v47 = vld [vmem:[%s3373_s21 + $0x98] sm:$0xff]  ;;  %v404_v56 = vld [vmem:[%s3373_s21 + $0xa0] sm:$0xff] }
  0x20   : > { %620 = vmatpush.bf16.msra.mxu0 %v2982_v3  ;;  %v457_v49 = vpack.c.bf16 %v403_v47, %v402_v46  ;;  %v405_v57 = vld [vmem:[%s3373_s21 + $0xa8] sm:$0xff]  ;;  %v406_v2 = vld [vmem:[%s3373_s21 + $0xb0] sm:$0xff]  ;;  %v407_v3 = vld [vmem:[%s3373_s21 + $0xb8] sm:$0xff] }
  0x21   : > { %949 = vmatpush.bf16.msra.mxu1 %v2990_v25  ;;  %v458_v59 = vpack.c.bf16 %v405_v57, %v404_v56  ;;  %v459_v5 = vpack.c.bf16 %v407_v3, %v406_v2  ;;  %v409_v13 = vld [vmem:[%s3373_s21 + $0xc8] sm:$0xff]  ;;  %v411_v23 = vld [vmem:[%s3373_s21 + $0xd8] sm:$0xff] }
  0x22   : > { %v413_v33 = vld [vmem:[%s3373_s21 + $0xe8] sm:$0xff]  ;;  %v419_v2 = vld [vmem:[%s3373_s21 + $0x118] sm:$0xff] }
  0x23   : > { %2841 = vmatmul.msk.bf16.vlgmr.msra.gmra.mxu0 %vm516_vm0, %v448_v6 }
  0x25   : > { %950 = vmatpush.bf16.msra.mxu1 %v2989_v28 }
  0x29   : > { %951 = vmatpush.bf16.msra.mxu1 %v2988_v30 }
  0x2d   : > { %952 = vmatpush.bf16.msra.mxu1 %v2987_v31 }
  0x31   : > { %953 = vmatpush.bf16.msra.mxu1 %v2986_v32  ;;  %v412_v32 = vld [vmem:[%s3373_s21 + $0xe0] sm:$0xff] }
  0x33   : > { %2842 = vmatmul.msk.bf16.gmra.mxu0 %vm516_vm0, %v449_v9 }
  0x43   : > { %2843 = vmatmul.msk.bf16.gmra.mxu0 %vm516_vm0, %v450_v12  ;;  %v408_v12 = vld [vmem:[%s3373_s21 + $0xc0] sm:$0xff] }
  0x53   : > { %2844 = vmatmul.msk.bf16.gmra.mxu0 %vm516_vm0, %v451_v15  ;;  %v460_v15 = vpack.c.bf16 %v409_v13, %v408_v12 }
  0x63   : > { %2845 = vmatmul.msk.bf16.gmra.mxu0 %vm516_vm0, %v452_v18 }
  0x73   : > { %2846 = vmatmul.msk.bf16.gmra.mxu0 %vm516_vm0, %v453_v22  ;;  %v410_v22 = vld [vmem:[%s3373_s21 + $0xd0] sm:$0xff] }
  0x74   : > { %v461_v25 = vpack.c.bf16 %v411_v23, %v410_v22 }
  0x83   : > { %2847 = vmatmul.msk.bf16.gmra.mxu0 %vm516_vm0, %v454_v29 }
  0x93   : > { %2848 = vmatmul.msk.bf16.gmra.mxu0 %vm516_vm0, %v455_v35  ;;  %v462_v35 = vpack.c.bf16 %v413_v33, %v412_v32 }
  0xa0   : > { %v622_v39 = vpop.f32.mrf.mxu0 }
  0xa1   : > { %v623_v41 = vadd.f32 %v3431_v40, %v622_v39 }
  0xa3   : > { %2849 = vmatmul.msk.bf16.gmra.mxu0 %vm516_vm0, %v456_v38  ;;  %v782_v44 = vmax.f32 %v623_v41, 0.0 }
  0xa8   : > { %v624_v42 = vpop.f32.mrf.mxu0 }
  0xa9   : > { %v625_v43 = vadd.f32 %v3431_v40, %v624_v42 }
  0xab   : > { %v783_v45 = vmax.f32 %v625_v43, 0.0  ;;  %v414_v43 = vld [vmem:[%s3373_s21 + $0xf0] sm:$0xff] }
  0xad   : > { %v846_v48 = vpack.c.bf16 %v783_v45, %v782_v44  ;;  %v415_v44 = vld [vmem:[%s3373_s21 + $0xf8] sm:$0xff] }
  0xae   : > { %v463_v46 = vpack.c.bf16 %v415_v44, %v414_v43 }
  0xaf   : > { %954 = vmatmul.bf16.vlgmr.msra.gmra.mxu1 %v846_v48 }
  0xb0   : > { %v627_v50 = vpop.f32.mrf.mxu0 }
  0xb1   : > { %v628_v51 = vadd.f32 %v3431_v40, %v627_v50 }
  0xb3   : > { %2850 = vmatmul.msk.bf16.gmra.mxu0 %vm516_vm0, %v457_v49  ;;  %v784_v54 = vmax.f32 %v628_v51, 0.0 }
  0xb8   : > { %v629_v52 = vpop.f32.mrf.mxu0 }
  0xb9   : > { %v630_v53 = vadd.f32 %v3431_v40, %v629_v52 }
  0xbb   : > { %v785_v55 = vmax.f32 %v630_v53, 0.0  ;;  %v416_v53 = vld [vmem:[%s3373_s21 + $0x100] sm:$0xff] }
  0xbd   : > { %v847_v58 = vpack.c.bf16 %v785_v55, %v784_v54  ;;  %v417_v54 = vld [vmem:[%s3373_s21 + $0x108] sm:$0xff] }
  0xbe   : > { %v464_v56 = vpack.c.bf16 %v417_v54, %v416_v53 }
  0xbf   : > { %959 = vmatmul.bf16.gmra.mxu1 %v847_v58 }
  0xc0   : > { %v632_v60 = vpop.f32.mrf.mxu0 }
  0xc1   : > { %v633_v61 = vadd.f32 %v3431_v40, %v632_v60 }
  0xc3   : > { %2851 = vmatmul.msk.bf16.gmra.mxu0 %vm516_vm0, %v458_v59  ;;  %v786_v0 = vmax.f32 %v633_v61, 0.0  ;;  %v3479_v61 = vld [vmem:[%s4642_s5] ss:$0 sm:$0xff] }
  0xc8   : > { %v634_v62 = vpop.f32.mrf.mxu0 }
  0xc9   : > { %v635_v63 = vadd.f32 %v3431_v40, %v634_v62 }
  0xcb   : > { %v787_v1 = vmax.f32 %v635_v63, 0.0 }
  0xcd   : > { %v848_v4 = vpack.c.bf16 %v787_v1, %v786_v0  ;;  %v418_v1 = vld [vmem:[%s3373_s21 + $0x110] sm:$0xff] }
  0xcf   : > { %964 = vmatmul.bf16.gmra.mxu1 %v848_v4 }
  0xd0   : > { %v637_v6 = vpop.f32.mrf.mxu0 }
  0xd1   : > { %v638_v7 = vadd.f32 %v3431_v40, %v637_v6  ;;  %v465_v6 = vpack.c.bf16 %v419_v2, %v418_v1 }
  0xd3   : > { %2852 = vmatmul.msk.bf16.gmra.mxu0 %vm516_vm0, %v459_v5  ;;  %v788_v10 = vmax.f32 %v638_v7, 0.0 }
  0xd8   : > { %v639_v8 = vpop.f32.mrf.mxu0 }
  0xd9   : > { %v640_v9 = vadd.f32 %v3431_v40, %v639_v8 }
  0xdb   : > { %v789_v11 = vmax.f32 %v640_v9, 0.0 }
  0xdd   : > { %v849_v14 = vpack.c.bf16 %v789_v11, %v788_v10 }
  0xdf   : > { %969 = vmatmul.bf16.gmra.mxu1 %v849_v14 }
  0xe0   : > { %v642_v16 = vpop.f32.mrf.mxu0 }
  0xe1   : > { %v643_v17 = vadd.f32 %v3431_v40, %v642_v16 }
  0xe3   : > { %2853 = vmatmul.msk.bf16.gmra.mxu0 %vm516_vm0, %v460_v15  ;;  %v790_v20 = vmax.f32 %v643_v17, 0.0 }
  0xe8   : > { %v644_v18 = vpop.f32.mrf.mxu0 }
  0xe9   : > { %v645_v19 = vadd.f32 %v3431_v40, %v644_v18 }
  0xeb   : > { %v791_v21 = vmax.f32 %v645_v19, 0.0 }
  0xed   : > { %v850_v24 = vpack.c.bf16 %v791_v21, %v790_v20  ;;  %v420_v20 = vld [vmem:[%s3373_s21 + $0x120] sm:$0xff]  ;;  %v421_v21 = vld [vmem:[%s3373_s21 + $0x128] sm:$0xff] }
  0xef   : > { %974 = vmatmul.bf16.gmra.mxu1 %v850_v24 }
  0xf0   : > { %v647_v26 = vpop.f32.mrf.mxu0 }
  0xf1   : > { %v648_v27 = vadd.f32 %v3431_v40, %v647_v26 }
  0xf3   : > { %2854 = vmatmul.msk.bf16.gmra.mxu0 %vm516_vm0, %v461_v25  ;;  %v792_v30 = vmax.f32 %v648_v27, 0.0  ;;  %v466_v25 = vpack.c.bf16 %v421_v21, %v420_v20  ;;  %v426_v20 = vld [vmem:[%s3373_s21 + $0x150] sm:$0xff]  ;;  %v427_v21 = vld [vmem:[%s3373_s21 + $0x158] sm:$0xff] }
  0xf8   : > { %v649_v28 = vpop.f32.mrf.mxu0 }
  0xf9   : > { %v650_v29 = vadd.f32 %v3431_v40, %v649_v28 }
  0xfb   : > { %v793_v31 = vmax.f32 %v650_v29, 0.0 }
  0xfd   : > { %v851_v34 = vpack.c.bf16 %v793_v31, %v792_v30 }
  0xff   : > { %979 = vmatmul.bf16.gmra.mxu1 %v851_v34 }
 0x100   : > { %v652_v36 = vpop.f32.mrf.mxu0 }
 0x101   : > { %v653_v37 = vadd.f32 %v3431_v40, %v652_v36 }
 0x103   : > { %2855 = vmatmul.msk.bf16.gmra.mxu0 %vm516_vm0, %v462_v35  ;;  %v794_v41 = vmax.f32 %v653_v37, 0.0 }
 0x108   : > { %v654_v38 = vpop.f32.mrf.mxu0 }
 0x109   : > { %v655_v39 = vadd.f32 %v3431_v40, %v654_v38 }
 0x10b   : > { %v795_v42 = vmax.f32 %v655_v39, 0.0 }
 0x10d   : > { %v852_v45 = vpack.c.bf16 %v795_v42, %v794_v41  ;;  %v422_v41 = vld [vmem:[%s3373_s21 + $0x130] sm:$0xff]  ;;  %v423_v42 = vld [vmem:[%s3373_s21 + $0x138] sm:$0xff] }
 0x10f   : > { %984 = vmatmul.bf16.gmra.mxu1 %v852_v45 }
 0x110   : > { %v657_v47 = vpop.f32.mrf.mxu0 }
 0x111   : > { %v658_v48 = vadd.f32 %v3431_v40, %v657_v47 }
 0x113   : > { %2856 = vmatmul.msk.bf16.gmra.mxu0 %vm516_vm0, %v463_v46  ;;  %v796_v51 = vmax.f32 %v658_v48, 0.0  ;;  %v467_v46 = vpack.c.bf16 %v423_v42, %v422_v41 }
 0x118   : > { %v659_v49 = vpop.f32.mrf.mxu0 }
 0x119   : > { %v660_v50 = vadd.f32 %v3431_v40, %v659_v49 }
 0x11b   : > { %v797_v52 = vmax.f32 %v660_v50, 0.0 }
 0x11d   : > { %v853_v55 = vpack.c.bf16 %v797_v52, %v796_v51 }
 0x11f   : > { %989 = vmatmul.bf16.gmra.mxu1 %v853_v55 }
 0x120   : > { %v662_v57 = vpop.f32.mrf.mxu0 }
 0x121   : > { %v663_v58 = vadd.f32 %v3431_v40, %v662_v57 }
 0x123   : > { %2857 = vmatmul.msk.bf16.gmra.mxu0 %vm516_vm0, %v464_v56  ;;  %v798_v62 = vmax.f32 %v663_v58, 0.0 }
 0x128   : > { %v664_v59 = vpop.f32.mrf.mxu0 }
 0x129   : > { %v665_v60 = vadd.f32 %v3431_v40, %v664_v59 }
 0x12b   : > { %v799_v63 = vmax.f32 %v665_v60, 0.0 }
 0x12c   : > { %v955_v0 = vpop.f32.mrf.mxu1 }
 0x12d   : > { %v3484_v3 = vadd.f32 %v3479_v61, %v955_v0  ;;  %v854_v4 = vpack.c.bf16 %v799_v63, %v798_v62  ;;  %v424_v62 = vld [vmem:[%s3373_s21 + $0x140] sm:$0xff]  ;;  %v425_v63 = vld [vmem:[%s3373_s21 + $0x148] sm:$0xff] }
 0x12f   : > { %v1179_v5 = vmul.f32 0.5, %v3484_v3  ;;  %994 = vmatmul.bf16.gmra.mxu1 %v854_v4  ;;  %v468_v4 = vpack.c.bf16 %v425_v63, %v424_v62 }
 0x130   : > { %v667_v7 = vpop.f32.mrf.mxu0 }
 0x131   : > { %v1243_v8 = vmul.f32 1.442695, %v1179_v5  ;;  %v668_v11 = vadd.f32 %v3431_v40, %v667_v7 }
 0x133   : > { %3052 = vpow2.f32 %v1243_v8  ;;  %2858 = vmatmul.msk.bf16.gmra.mxu0 %vm516_vm0, %v465_v6  ;;  %v800_v17 = vmax.f32 %v668_v11, 0.0 }
 0x134   : > { %v957_v9 = vpop.f32.mrf.mxu1 }
 0x135   : > { %v3489_v10 = vadd.f32 %v3479_v61, %v957_v9 }
 0x137   : > { %v1180_v12 = vmul.f32 0.5, %v3489_v10 }
 0x138   : > { %v669_v13 = vpop.f32.mrf.mxu0 }
 0x139   : > { %v3053_v14 = vpop.eup %3052  ;;  %v1245_v15 = vmul.f32 1.442695, %v1180_v12  ;;  %v670_v16 = vadd.f32 %v3431_v40, %v669_v13 }
 0x13a   : > { %1435 = vrot.lane.b32.xlu0 %v3053_v14, %s3248_s18 }
 0x13b   : > { %3054 = vpow2.f32 %v1245_v15  ;;  %v801_v18 = vmax.f32 %v670_v16, 0.0 }
 0x13c   : > { %v960_v19 = vpop.f32.mrf.mxu1 }
 0x13d   : > { %v3498_v22 = vadd.f32 %v3479_v61, %v960_v19  ;;  %v855_v23 = vpack.c.bf16 %v801_v18, %v800_v17 }
 0x13f   : > { %v1181_v24 = vmul.f32 0.5, %v3498_v22  ;;  %999 = vmatmul.bf16.gmra.mxu1 %v855_v23 }
 0x140   : > { %v672_v26 = vpop.f32.mrf.mxu0 }
 0x141   : > { %v3055_v27 = vpop.eup %3054  ;;  %v1247_v28 = vmul.f32 1.442695, %v1181_v24  ;;  %v673_v31 = vadd.f32 %v3431_v40, %v672_v26  ;;  %v469_v26 = vpack.c.bf16 %v427_v21, %v426_v20  ;;  %v2994_v20 = vld [vmem:[%s4643_s6] sm:$0xff] }
 0x142   : > { %1437 = vrot.lane.b32.xlu0 %v3055_v27, %s3248_s18 }
 0x143   : > { %3056 = vpow2.f32 %v1247_v28  ;;  %2859 = vmatmul.msk.bf16.gmra.mxu0 %vm516_vm0, %v466_v25  ;;  %v802_v37 = vmax.f32 %v673_v31, 0.0 }
 0x144   : > { %v962_v29 = vpop.f32.mrf.mxu1 }
 0x145   : > { %v3504_v30 = vadd.f32 %v3479_v61, %v962_v29 }
 0x147   : > { %v1182_v32 = vmul.f32 0.5, %v3504_v30 }
 0x148   : > { %v674_v33 = vpop.f32.mrf.mxu0 }
 0x149   : > { %v3057_v34 = vpop.eup %3056  ;;  %v1249_v35 = vmul.f32 1.442695, %v1182_v32  ;;  %v675_v36 = vadd.f32 %v3431_v40, %v674_v33 }
 0x14a   : > { %1439 = vrot.lane.b32.xlu1 %v3057_v34, %s3248_s18 }
 0x14b   : > { %3058 = vpow2.f32 %v1249_v35  ;;  %v803_v38 = vmax.f32 %v675_v36, 0.0 }
 0x14c   : > { %v965_v39 = vpop.f32.mrf.mxu1 }
 0x14d   : > { %v3513_v43 = vadd.f32 %v3479_v61, %v965_v39  ;;  %v856_v44 = vpack.c.bf16 %v803_v38, %v802_v37 }
 0x14f   : > { %v1183_v45 = vmul.f32 0.5, %v3513_v43  ;;  %1004 = vmatmul.bf16.gmra.mxu1 %v856_v44  ;;  %v428_v44 = vld [vmem:[%s3373_s21 + $0x160] sm:$0xff] }
 0x150   : > { %v677_v47 = vpop.f32.mrf.mxu0 }
 0x151   : > { %v3059_v48 = vpop.eup %3058  ;;  %v1251_v49 = vmul.f32 1.442695, %v1183_v45  ;;  %v678_v52 = vadd.f32 %v3431_v40, %v677_v47  ;;  %v429_v45 = vld [vmem:[%s3373_s21 + $0x168] sm:$0xff] }
 0x152   : > { %1441 = vrot.lane.b32.xlu1 %v3059_v48, %s3248_s18 }
 0x153   : > { %3060 = vpow2.f32 %v1251_v49  ;;  %2860 = vmatmul.msk.bf16.gmra.mxu0 %vm516_vm0, %v467_v46  ;;  %v804_v58 = vmax.f32 %v678_v52, 0.0  ;;  %v470_v49 = vpack.c.bf16 %v429_v45, %v428_v44 }
 0x154   : > { %v967_v50 = vpop.f32.mrf.mxu1 }
 0x155   : > { %v3519_v51 = vadd.f32 %v3479_v61, %v967_v50 }
 0x157   : > { %v1184_v53 = vmul.f32 0.5, %v3519_v51 }
 0x158   : > { %v679_v54 = vpop.f32.mrf.mxu0 }
 0x159   : > { %v3061_v55 = vpop.eup %3060  ;;  %v1253_v56 = vmul.f32 1.442695, %v1184_v53  ;;  %v680_v57 = vadd.f32 %v3431_v40, %v679_v54 }
 0x15a   : > { %1443 = vrot.lane.b32.xlu2 %v3061_v55, %s3248_s18 }
 0x15b   : > { %3062 = vpow2.f32 %v1253_v56  ;;  %v805_v59 = vmax.f32 %v680_v57, 0.0 }
 0x15c   : > { %v970_v60 = vpop.f32.mrf.mxu1 }
 0x15d   : > { %v3528_v0 = vadd.f32 %v3479_v61, %v970_v60  ;;  %v857_v1 = vpack.c.bf16 %v805_v59, %v804_v58 }
 0x15f   : > { %v1185_v2 = vmul.f32 0.5, %v3528_v0  ;;  %1009 = vmatmul.bf16.gmra.mxu1 %v857_v1 }
 0x160   : > { %v682_v5 = vpop.f32.mrf.mxu0 }
 0x161   : > { %v3063_v6 = vpop.eup %3062  ;;  %v1255_v7 = vmul.f32 1.442695, %v1185_v2  ;;  %v683_v11 = vadd.f32 %v3431_v40, %v682_v5  ;;  %v431_v5 = vld [vmem:[%s3373_s21 + $0x178] sm:$0xff] }
 0x162   : > { %1445 = vrot.lane.b32.xlu2 %v3063_v6, %s3248_s18 }
 0x163   : > { %3064 = vpow2.f32 %v1255_v7  ;;  %2861 = vmatmul.msk.bf16.gmra.mxu0 %vm516_vm0, %v468_v4  ;;  %v806_v17 = vmax.f32 %v683_v11, 0.0  ;;  %v430_v4 = vld [vmem:[%s3373_s21 + $0x170] sm:$0xff] }
 0x164   : > { %v972_v8 = vpop.f32.mrf.mxu1  ;;  %v471_v11 = vpack.c.bf16 %v431_v5, %v430_v4 }
 0x165   : > { %v3534_v9 = vadd.f32 %v3479_v61, %v972_v8 }
 0x167   : > { %v1186_v12 = vmul.f32 0.5, %v3534_v9 }
 0x168   : > { %v684_v13 = vpop.f32.mrf.mxu0 }
 0x169   : > { %v3065_v14 = vpop.eup %3064  ;;  %v1257_v15 = vmul.f32 1.442695, %v1186_v12  ;;  %v685_v16 = vadd.f32 %v3431_v40, %v684_v13 }
 0x16a   : > { %1447 = vrot.lane.b32.xlu0 %v3065_v14, %s3248_s18 }
 0x16b   : > { %3066 = vpow2.f32 %v1257_v15  ;;  %v807_v18 = vmax.f32 %v685_v16, 0.0  ;;  %v2995_v15 = vld [vmem:[%s4643_s6 + $0x8] sm:$0xff] }
 0x16c   : > { %v975_v19 = vpop.f32.mrf.mxu1  ;;  %1910 = vmatpush.bf16.msra.mxu2 %v2995_v15 }
 0x16d   : > { %v3543_v23 = vadd.f32 %v3479_v61, %v975_v19  ;;  %v858_v24 = vpack.c.bf16 %v807_v18, %v806_v17 }
 0x16f   : > { %v1187_v25 = vmul.f32 0.5, %v3543_v23  ;;  %1014 = vmatmul.bf16.gmra.mxu1 %v858_v24 }
 0x170   : > { %v687_v27 = vpop.f32.mrf.mxu0  ;;  %1911 = vmatpush.bf16.msra.mxu2 %v2994_v20 }
 0x171   : > { %v3067_v28 = vpop.eup %3066  ;;  %v1259_v29 = vmul.f32 1.442695, %v1187_v25  ;;  %v688_v33 = vadd.f32 %v3431_v40, %v687_v27 }
 0x172   : > { %1449 = vrot.lane.b32.xlu1 %v3067_v28, %s3248_s18 }
 0x173   : > { %3068 = vpow2.f32 %v1259_v29  ;;  %2862 = vmatmul.msk.bf16.gmra.mxu0 %vm516_vm0, %v469_v26  ;;  %v808_v39 = vmax.f32 %v688_v33, 0.0  ;;  %v433_v33 = vld [vmem:[%s3373_s21 + $0x188] sm:$0xff] }
 0x174   : > { %v977_v31 = vpop.f32.mrf.mxu1 }
 0x175   : > { %v3549_v32 = vadd.f32 %v3479_v61, %v977_v31  ;;  %v432_v31 = vld [vmem:[%s3373_s21 + $0x180] sm:$0xff] }
 0x177   : > { %v1188_v34 = vmul.f32 0.5, %v3549_v32 }
 0x178   : > { %v689_v35 = vpop.f32.mrf.mxu0 }
 0x179   : > { %v3069_v36 = vpop.eup %3068  ;;  %v1261_v37 = vmul.f32 1.442695, %v1188_v34  ;;  %v690_v38 = vadd.f32 %v3431_v40, %v689_v35 }
 0x17a   : > { %1451 = vrot.lane.b32.xlu2 %v3069_v36, %s3248_s18 }
 0x17b   : > { %3070 = vpow2.f32 %v1261_v37  ;;  %v809_v41 = vmax.f32 %v690_v38, 0.0  ;;  %v472_v37 = vpack.c.bf16 %v433_v33, %v432_v31  ;;  %v436_v33 = vld [vmem:[%s3373_s21 + $0x1a0] sm:$0xff] }
 0x17c   : > { %v980_v42 = vpop.f32.mrf.mxu1 }
 0x17d   : > { %v3558_v46 = vadd.f32 %v3479_v61, %v980_v42  ;;  %v859_v47 = vpack.c.bf16 %v809_v41, %v808_v39 }
 0x17f   : > { %v1189_v48 = vmul.f32 0.5, %v3558_v46  ;;  %1019 = vmatmul.bf16.gmra.mxu1 %v859_v47 }
 0x180   : > { %v692_v50 = vpop.f32.mrf.mxu0 }
 0x181   : > { %v3071_v52 = vpop.eup %3070  ;;  %v1263_v53 = vmul.f32 1.442695, %v1189_v48  ;;  %v693_v56 = vadd.f32 %v3431_v40, %v692_v50 }
 0x182   : > { %1453 = vrot.lane.b32.xlu0 %v3071_v52, %s3248_s18 }
 0x183   : > { %3072 = vpow2.f32 %v1263_v53  ;;  %2863 = vmatmul.msk.bf16.gmra.mxu0 %vm516_vm0, %v470_v49  ;;  %v810_v63 = vmax.f32 %v693_v56, 0.0 }
 0x184   : > { %v982_v54 = vpop.f32.mrf.mxu1 }
 0x185   : > { %v3564_v55 = vadd.f32 %v3479_v61, %v982_v54 }
 0x187   : > { %v1190_v57 = vmul.f32 0.5, %v3564_v55 }
 0x188   : > { %v694_v58 = vpop.f32.mrf.mxu0 }
 0x189   : > { %v3073_v59 = vpop.eup %3072  ;;  %v1265_v60 = vmul.f32 1.442695, %v1190_v57  ;;  %v695_v62 = vadd.f32 %v3431_v40, %v694_v58  ;;  %v434_v58 = vld [vmem:[%s3373_s21 + $0x190] sm:$0xff] }
 0x18a   : > { %1455 = vrot.lane.b32.xlu1 %v3073_v59, %s3248_s18  ;;  %v435_v59 = vld [vmem:[%s3373_s21 + $0x198] sm:$0xff] }
 0x18b   : > { %3074 = vpow2.f32 %v1265_v60  ;;  %v811_v1 = vmax.f32 %v695_v62, 0.0 }
 0x18c   : > { %v985_v2 = vpop.f32.mrf.mxu1 }
 0x18d   : > { %v3573_v6 = vadd.f32 %v3479_v61, %v985_v2  ;;  %v860_v7 = vpack.c.bf16 %v811_v1, %v810_v63  ;;  %v473_v1 = vpack.c.bf16 %v435_v59, %v434_v58 }
 0x18f   : > { %v1191_v8 = vmul.f32 0.5, %v3573_v6  ;;  %1024 = vmatmul.bf16.gmra.mxu1 %v860_v7  ;;  %v1115_v7 = vld [vmem:[%s3616_s12] sm:$0xff] }
 0x190   : > { %v697_v12 = vpop.f32.mrf.mxu0 }
 0x191   : > { %v3075_v13 = vpop.eup %3074  ;;  %v1267_v14 = vmul.f32 1.442695, %v1191_v8  ;;  %v698_v18 = vadd.f32 %v3431_v40, %v697_v12  ;;  %v1116_v8 = vld [vmem:[%s3616_s12 + $0x8] sm:$0xff] }
 0x192   : > { %1457 = vrot.lane.b32.xlu2 %v3075_v13, %s3248_s18 }
 0x193   : > { %3076 = vpow2.f32 %v1267_v14  ;;  %2864 = vmatmul.msk.bf16.gmra.mxu0 %vm516_vm0, %v471_v11  ;;  %v812_v27 = vmax.f32 %v698_v18, 0.0 }
 0x194   : > { %v987_v16 = vpop.f32.mrf.mxu1 }
 0x195   : > { %v3582_v17 = vadd.f32 %v3479_v61, %v987_v16 }
 0x197   : > { %v1192_v19 = vmul.f32 0.5, %v3582_v17 }
 0x198   : > { %v699_v21 = vpop.f32.mrf.mxu0 }
 0x199   : > { %v3077_v24 = vpop.eup %3076  ;;  %v1269_v25 = vmul.f32 1.442695, %v1192_v19  ;;  %v700_v26 = vadd.f32 %v3431_v40, %v699_v21 }
 0x19a   : > { %1459 = vrot.lane.b32.xlu0 %v3077_v24, %s3248_s18 }
 0x19b   : > { %3078 = vpow2.f32 %v1269_v25  ;;  %v813_v28 = vmax.f32 %v700_v26, 0.0 }
 0x19c   : > { %v990_v29 = vpop.f32.mrf.mxu1 }
 0x19d   : > { %v3594_v34 = vadd.f32 %v3479_v61, %v990_v29  ;;  %v861_v35 = vpack.c.bf16 %v813_v28, %v812_v27 }
 0x19f   : > { %v1193_v36 = vmul.f32 0.5, %v3594_v34  ;;  %1029 = vmatmul.bf16.gmra.mxu1 %v861_v35  ;;  %v437_v35 = vld [vmem:[%s3373_s21 + $0x1a8] sm:$0xff] }
 0x1a0   : > { %v702_v38 = vpop.f32.mrf.mxu0 }
 0x1a1   : > { %v3079_v39 = vpop.eup %3078  ;;  %v1271_v41 = vmul.f32 1.442695, %v1193_v36  ;;  %v703_v45 = vadd.f32 %v3431_v40, %v702_v38 }
 0x1a2   : > { %1461 = vrot.lane.b32.xlu1 %v3079_v39, %s3248_s18 }
 0x1a3   : > { %3080 = vpow2.f32 %v1271_v41  ;;  %2865 = vmatmul.msk.bf16.gmra.mxu0 %vm516_vm0, %v472_v37  ;;  %v814_v53 = vmax.f32 %v703_v45, 0.0  ;;  %v474_v41 = vpack.c.bf16 %v437_v35, %v436_v33 }
 0x1a4   : > { %v992_v42 = vpop.f32.mrf.mxu1 }
 0x1a5   : > { %v3600_v44 = vadd.f32 %v3479_v61, %v992_v42 }
 0x1a7   : > { %v1194_v47 = vmul.f32 0.5, %v3600_v44 }
 0x1a8   : > { %v704_v48 = vpop.f32.mrf.mxu0 }
 0x1a9   : > { %v3081_v49 = vpop.eup %3080  ;;  %v1273_v50 = vmul.f32 1.442695, %v1194_v47  ;;  %v705_v52 = vadd.f32 %v3431_v40, %v704_v48  ;;  %v1117_v48 = vld [vmem:[%s3616_s12 + $0x10] sm:$0xff] }
 0x1aa   : > { %1463 = vrot.lane.b32.xlu2 %v3081_v49, %s3248_s18  ;;  %v1118_v49 = vld [vmem:[%s3616_s12 + $0x18] sm:$0xff] }
 0x1ab   : > { %3082 = vpow2.f32 %v1273_v50  ;;  %v815_v54 = vmax.f32 %v705_v52, 0.0 }
 0x1ac   : > { %v995_v56 = vpop.f32.mrf.mxu1  ;;  %v1436_v57 = vpop.permute.xlu0 %1435 }
 0x1ad   : > { %v3609_v60 = vadd.f32 %v3479_v61, %v995_v56  ;;  %v862_v62 = vpack.c.bf16 %v815_v54, %v814_v53  ;;  %v1627_v11 = vmul.f32 %v1436_v57, %v1115_v7 }
 0x1af   : > { %v1195_v63 = vmul.f32 0.5, %v3609_v60  ;;  %1034 = vmatmul.bf16.gmra.mxu1 %v862_v62  ;;  %v1691_v19 = vadd.f32 %v1627_v11, %v3484_v3 }
 0x1b0   : > { %v707_v2 = vpop.f32.mrf.mxu0 }
 0x1b1   : > { %v3083_v4 = vpop.eup %3082  ;;  %v1275_v5 = vmul.f32 1.442695, %v1195_v63  ;;  %v708_v16 = vadd.f32 %v3431_v40, %v707_v2 }
 0x1b2   : > { %1465 = vrot.lane.b32.xlu0 %v3083_v4, %s3248_s18 }
 0x1b3   : > { %3084 = vpow2.f32 %v1275_v5  ;;  %2866 = vmatmul.msk.bf16.gmra.mxu0 %vm516_vm0, %v473_v1  ;;  %v816_v28 = vmax.f32 %v708_v16, 0.0 }
 0x1b4   : > { %v997_v12 = vpop.f32.mrf.mxu1  ;;  %v1438_v14 = vpop.permute.xlu0 %1437 }
 0x1b5   : > { %v3624_v13 = vadd.f32 %v3479_v61, %v997_v12  ;;  %v1628_v15 = vmul.f32 %v1438_v14, %v1116_v8  ;;  %v1444_v53 = vpop.permute.xlu2 %1443  ;;  %v438_v14 = vld [vmem:[%s3373_s21 + $0x1b0] sm:$0xff] }
 0x1b7   : > { %v1196_v18 = vmul.f32 0.5, %v3624_v13  ;;  %v1692_v20 = vadd.f32 %v1628_v15, %v3489_v10  ;;  %v439_v15 = vld [vmem:[%s3373_s21 + $0x1b8] sm:$0xff] }
 0x1b8   : > { %v709_v21 = vpop.f32.mrf.mxu0 }
 0x1b9   : > { %v3085_v24 = vpop.eup %3084  ;;  %v1277_v25 = vmul.f32 1.442695, %v1196_v18  ;;  %v710_v26 = vadd.f32 %v3431_v40, %v709_v21  ;;  %v1755_v27 = vpack.c.bf16 %v1692_v20, %v1691_v19  ;;  %v1120_v19 = vld [vmem:[%s3616_s12 + $0x28] sm:$0xff] }
 0x1ba   : > { %1467 = vrot.lane.b32.xlu1 %v3085_v24, %s3248_s18  ;;  %v475_v24 = vpack.c.bf16 %v439_v15, %v438_v14 }
 0x1bb   : > { %3086 = vpow2.f32 %v1277_v25  ;;  %v817_v29 = vmax.f32 %v710_v26, 0.0  ;;  %2913 = vmatmul.msk.bf16.vlgmr.msra.gmra.mxu2 %vm1807_vm1, %v1755_v27  ;;  %v1119_v27 = vld [vmem:[%s3616_s12 + $0x20] sm:$0xff] }
 0x1bc   : > { %v1000_v31 = vpop.f32.mrf.mxu1  ;;  %v1440_v37 = vpop.permute.xlu1 %1439 }
 0x1bd   : > { %v3636_v36 = vadd.f32 %v3479_v61, %v1000_v31  ;;  %v863_v38 = vpack.c.bf16 %v817_v29, %v816_v28  ;;  %v1629_v50 = vmul.f32 %v1440_v37, %v1117_v48  ;;  %v1446_v20 = vpop.permute.xlu2 %1445  ;;  %v1631_v31 = vmul.f32 %v1444_v53, %v1119_v27 }
 0x1be   : > { %v1632_v29 = vmul.f32 %v1446_v20, %v1120_v19 }
 0x1bf   : > { %v1197_v39 = vmul.f32 0.5, %v3636_v36  ;;  %1039 = vmatmul.bf16.gmra.mxu1 %v863_v38  ;;  %v1693_v62 = vadd.f32 %v1629_v50, %v3498_v22 }
 0x1c0   : > { %v712_v42 = vpop.f32.mrf.mxu0  ;;  %v1696_v37 = vadd.f32 %v1632_v29, %v3519_v51 }
 0x1c1   : > { %v3087_v45 = vpop.eup %3086  ;;  %v1279_v47 = vmul.f32 1.442695, %v1197_v39  ;;  %v713_v58 = vadd.f32 %v3431_v40, %v712_v42 }
 0x1c2   : > { %1469 = vrot.lane.b32.xlu2 %v3087_v45, %s3248_s18 }
 0x1c3   : > { %3088 = vpow2.f32 %v1279_v47  ;;  %2867 = vmatmul.msk.bf16.gmra.mxu0 %vm516_vm0, %v474_v41  ;;  %v818_v8 = vmax.f32 %v713_v58, 0.0  ;;  %v1695_v41 = vadd.f32 %v1631_v31, %v3513_v43 }
 0x1c4   : > { %v1002_v52 = vpop.f32.mrf.mxu1  ;;  %v1442_v56 = vpop.permute.xlu1 %1441 }
 0x1c5   : > { %v3644_v54 = vadd.f32 %v3479_v61, %v1002_v52  ;;  %v1630_v57 = vmul.f32 %v1442_v56, %v1118_v49  ;;  %v1757_v49 = vpack.c.bf16 %v1696_v37, %v1695_v41  ;;  %v440_v56 = vld [vmem:[%s3373_s21 + $0x1c0] sm:$0xff] }
 0x1c7   : > { %v1198_v59 = vmul.f32 0.5, %v3644_v54  ;;  %v1694_v63 = vadd.f32 %v1630_v57, %v3504_v30  ;;  %v441_v57 = vld [vmem:[%s3373_s21 + $0x1c8] sm:$0xff] }
 0x1c8   : > { %v714_v1 = vpop.f32.mrf.mxu0 }
 0x1c9   : > { %v3089_v2 = vpop.eup %3088  ;;  %v1281_v4 = vmul.f32 1.442695, %v1198_v59  ;;  %v715_v5 = vadd.f32 %v3431_v40, %v714_v1  ;;  %v1756_v7 = vpack.c.bf16 %v1694_v63, %v1693_v62  ;;  %v476_v63 = vpack.c.bf16 %v441_v57, %v440_v56  ;;  %v1121_v1 = vld [vmem:[%s3616_s12 + $0x30] sm:$0xff]  ;;  %v1124_v56 = vld [vmem:[%s3616_s12 + $0x48] sm:$0xff] }
 0x1ca   : > { %1471 = vrot.lane.b32.xlu0 %v3089_v2, %s3248_s18 }
 0x1cb   : > { %3090 = vpow2.f32 %v1281_v4  ;;  %v819_v11 = vmax.f32 %v715_v5, 0.0  ;;  %2914 = vmatmul.msk.bf16.gmra.mxu2 %vm1807_vm1, %v1756_v7 }
 0x1cc   : > { %v1005_v12 = vpop.f32.mrf.mxu1 }
 0x1cd   : > { %v3656_v16 = vadd.f32 %v3479_v61, %v1005_v12  ;;  %v864_v18 = vpack.c.bf16 %v819_v11, %v818_v8  ;;  %v1122_v8 = vld [vmem:[%s3616_s12 + $0x38] sm:$0xff] }
 0x1cf   : > { %v1199_v21 = vmul.f32 0.5, %v3656_v16  ;;  %1044 = vmatmul.bf16.gmra.mxu1 %v864_v18 }
 0x1d0   : > { %v717_v25 = vpop.f32.mrf.mxu0 }
 0x1d1   : > { %v3091_v26 = vpop.eup %3090  ;;  %v1283_v28 = vmul.f32 1.442695, %v1199_v21  ;;  %v718_v38 = vadd.f32 %v3431_v40, %v717_v25 }
 0x1d2   : > { %1473 = vrot.lane.b32.xlu1 %v3091_v26, %s3248_s18 }
 0x1d3   : > { %3092 = vpow2.f32 %v1283_v28  ;;  %2868 = vmatmul.msk.bf16.gmra.mxu0 %vm516_vm0, %v475_v24  ;;  %v820_v50 = vmax.f32 %v718_v38, 0.0  ;;  %v442_v38 = vld [vmem:[%s3373_s21 + $0x1d0] sm:$0xff] }
 0x1d4   : > { %v1007_v33 = vpop.f32.mrf.mxu1 }
 0x1d5   : > { %v3664_v35 = vadd.f32 %v3479_v61, %v1007_v33 }
 0x1d7   : > { %v1200_v39 = vmul.f32 0.5, %v3664_v35 }
 0x1d8   : > { %v719_v42 = vpop.f32.mrf.mxu0 }
 0x1d9   : > { %v3093_v45 = vpop.eup %3092  ;;  %v1285_v47 = vmul.f32 1.442695, %v1200_v39  ;;  %v720_v48 = vadd.f32 %v3431_v40, %v719_v42  ;;  %v443_v39 = vld [vmem:[%s3373_s21 + $0x1d8] sm:$0xff] }
 0x1da   : > { %1475 = vrot.lane.b32.xlu2 %v3093_v45, %s3248_s18 }
 0x1db   : > { %3094 = vpow2.f32 %v1285_v47  ;;  %v821_v52 = vmax.f32 %v720_v48, 0.0  ;;  %2915 = vmatmul.msk.bf16.gmra.mxu2 %vm1807_vm1, %v1757_v49  ;;  %v477_v47 = vpack.c.bf16 %v443_v39, %v442_v38  ;;  %v1123_v48 = vld [vmem:[%s3616_s12 + $0x40] sm:$0xff]  ;;  %v1452_v49 = vpop.permute.xlu2 %1451  ;;  %v1126_v38 = vld [vmem:[%s3616_s12 + $0x58] sm:$0xff] }
 0x1dc   : > { %v1010_v53 = vpop.f32.mrf.mxu1  ;;  %v1448_v2 = vpop.permute.xlu0 %1447  ;;  %v1635_v57 = vmul.f32 %v1452_v49, %v1123_v48 }
 0x1dd   : > { %v3676_v58 = vadd.f32 %v3479_v61, %v1010_v53  ;;  %v865_v59 = vpack.c.bf16 %v821_v52, %v820_v50  ;;  %v1633_v11 = vmul.f32 %v1448_v2, %v1121_v1 }
 0x1de   : > { %v1699_v2 = vadd.f32 %v1635_v57, %v3543_v23 }
 0x1df   : > { %v1201_v62 = vmul.f32 0.5, %v3676_v58  ;;  %1049 = vmatmul.bf16.gmra.mxu1 %v865_v59  ;;  %v1697_v19 = vadd.f32 %v1633_v11, %v3528_v0 }
 0x1e0   : > { %v722_v4 = vpop.f32.mrf.mxu0 }
 0x1e1   : > { %v3095_v5 = vpop.eup %3094  ;;  %v1287_v7 = vmul.f32 1.442695, %v1201_v62  ;;  %v723_v20 = vadd.f32 %v3431_v40, %v722_v4 }
 0x1e2   : > { %1477 = vrot.lane.b32.xlu0 %v3095_v5, %s3248_s18 }
 0x1e3   : > { %3096 = vpow2.f32 %v1287_v7  ;;  %2869 = vmatmul.msk.bf16.gmra.mxu0 %vm516_vm0, %v476_v63  ;;  %v822_v31 = vmax.f32 %v723_v20, 0.0 }
 0x1e4   : > { %v1012_v12 = vpop.f32.mrf.mxu1  ;;  %v1450_v14 = vpop.permute.xlu1 %1449 }
 0x1e5   : > { %v3684_v15 = vadd.f32 %v3479_v61, %v1012_v12  ;;  %v1634_v18 = vmul.f32 %v1450_v14, %v1122_v8 }
 0x1e7   : > { %4669 = vst [vmem:[#allocation5_spill] sm:$0xff] %v3684_v15  ;;  %v1202_v21 = vmul.f32 0.5, %v3684_v15  ;;  %v1698_v24 = vadd.f32 %v1634_v18, %v3534_v9 }
 0x1e8   : > { %v724_v25 = vpop.f32.mrf.mxu0 }
 0x1e9   : > { %v3097_v26 = vpop.eup %3096  ;;  %v1289_v27 = vmul.f32 1.442695, %v1202_v21  ;;  %v725_v28 = vadd.f32 %v3431_v40, %v724_v25  ;;  %v1758_v29 = vpack.c.bf16 %v1698_v24, %v1697_v19  ;;  %v444_v24 = vld [vmem:[%s3373_s21 + $0x1e0] sm:$0xff]  ;;  %v445_v25 = vld [vmem:[%s3373_s21 + $0x1e8] sm:$0xff] }
 0x1ea   : > { %1479 = vrot.lane.b32.xlu1 %v3097_v26, %s3248_s18 }
 0x1eb   : > { %3098 = vpow2.f32 %v1289_v27  ;;  %v823_v33 = vmax.f32 %v725_v28, 0.0  ;;  %2916 = vmatmul.msk.bf16.gmra.mxu2 %vm1807_vm1, %v1758_v29  ;;  %v1125_v29 = vld [vmem:[%s3616_s12 + $0x50] sm:$0xff] }
 0x1ec   : > { %v1015_v37 = vpop.f32.mrf.mxu1  ;;  %v1458_v39 = vpop.permute.xlu2 %1457 }
 0x1ed   : > { %v866_v41 = vpack.c.bf16 %v823_v33, %v822_v31  ;;  %v3696_v42 = vadd.f32 %v3479_v61, %v1015_v37  ;;  %v478_v31 = vpack.c.bf16 %v445_v25, %v444_v24  ;;  %v3002_v24 = vld [vmem:[%s4645_s8 + $0x30] sm:$0xff]  ;;  %v1127_v25 = vld [vmem:[%s3616_s12 + $0x60] sm:$0xff] }
 0x1ef   : > { %v1203_v45 = vmul.f32 0.5, %v3696_v42  ;;  %1054 = vmatmul.bf16.gmra.mxu1 %v866_v41 }
 0x1f0   : > { %v727_v50 = vpop.f32.mrf.mxu0 }
 0x1f1   : > { %v3099_v52 = vpop.eup %3098  ;;  %v1291_v53 = vmul.f32 1.442695, %v1203_v45  ;;  %v728_v4 = vadd.f32 %v3431_v40, %v727_v50 }
 0x1f2   : > { %1481 = vrot.lane.b32.xlu2 %v3099_v52, %s3248_s18  ;;  %v3730_v52 = vld [vmem:[%s4640_s3] ss:$0 sm:$0xff] }
 0x1f3   : > { %3100 = vpow2.f32 %v1291_v53  ;;  %2870 = vmatmul.msk.bf16.gmra.mxu0 %vm516_vm0, %v477_v47  ;;  %v824_v19 = vmax.f32 %v728_v4, 0.0  ;;  %v1638_v47 = vmul.f32 %v1458_v39, %v1126_v38 }
 0x1f4   : > { %v1017_v59 = vpop.f32.mrf.mxu1  ;;  %v1454_v62 = vpop.permute.xlu0 %1453 }
 0x1f5   : > { %v3704_v63 = vadd.f32 %v3479_v61, %v1017_v59  ;;  %v1636_v1 = vmul.f32 %v1454_v62, %v1124_v56  ;;  %v1702_v57 = vadd.f32 %v1638_v47, %v3564_v55 }
 0x1f7   : > { %v1204_v5 = vmul.f32 0.5, %v3704_v63  ;;  %v1700_v7 = vadd.f32 %v1636_v1, %v3549_v32 }
 0x1f8   : > { %v729_v8 = vpop.f32.mrf.mxu0 }
 0x1f9   : > { %v3101_v11 = vpop.eup %3100  ;;  %v1293_v12 = vmul.f32 1.442695, %v1204_v5  ;;  %v730_v14 = vadd.f32 %v3431_v40, %v729_v8  ;;  %v1759_v18 = vpack.c.bf16 %v1700_v7, %v1699_v2  ;;  %v3003_v8 = vld [vmem:[%s4645_s8 + $0x38] sm:$0xff] }
 0x1fa   : > { %1483 = vrot.lane.b32.xlu0 %v3101_v11, %s3248_s18  ;;  %2173 = vmatpush.bf16.msra.mxu3 %v3003_v8 }
 0x1fb   : > { %3102 = vpow2.f32 %v1293_v12  ;;  %v825_v20 = vmax.f32 %v730_v14, 0.0  ;;  %2917 = vmatmul.msk.bf16.gmra.mxu2 %vm1807_vm1, %v1759_v18  ;;  %v446_v12 = vld [vmem:[%s3373_s21 + $0x1f0] sm:$0xff]  ;;  %v447_v14 = vld [vmem:[%s3373_s21 + $0x1f8] sm:$0xff]  ;;  %s3249_s21 = smov 64  }
 0x1fc   : > { %v1020_v21 = vpop.f32.mrf.mxu1  ;;  %v1456_v40 = vpop.permute.xlu1 %1455 }
 0x1fd   : > { %v867_v26 = vpack.c.bf16 %v825_v20, %v824_v19  ;;  %v3716_v27 = vadd.f32 %v3479_v61, %v1020_v21  ;;  %v1637_v45 = vmul.f32 %v1456_v40, %v1125_v29  ;;  %v479_v21 = vpack.c.bf16 %v447_v14, %v446_v12 }
 0x1fe   : > { %2174 = vmatpush.bf16.msra.mxu3 %v3002_v24 }
 0x1ff   : > { %4670 = vst [vmem:[#allocation6_spill] sm:$0xff] %v3716_v27  ;;  %v1205_v28 = vmul.f32 0.5, %v3716_v27  ;;  %1059 = vmatmul.bf16.gmra.mxu1 %v867_v26  ;;  %v1701_v50 = vadd.f32 %v1637_v45, %v3558_v46 }
 0x200   : > { %v732_v33 = vpop.f32.mrf.mxu0 }
 0x201   : > { %v3103_v37 = vpop.eup %3102  ;;  %v1295_v41 = vmul.f32 1.442695, %v1205_v28  ;;  %v733_v53 = vadd.f32 %v3730_v52, %v732_v33  ;;  %v1760_v4 = vpack.c.bf16 %v1702_v57, %v1701_v50 }
 0x202   : > { %1485 = vrot.lane.b32.xlu1 %v3103_v37, %s3248_s18  ;;  %v3001_v37 = vld [vmem:[%s4645_s8 + $0x28] sm:$0xff] }
 0x203   : > { %3104 = vpow2.f32 %v1295_v41  ;;  %2871 = vmatmul.msk.bf16.gmra.mxu0 %vm516_vm0, %v478_v31  ;;  %v826_v5 = vmax.f32 %v733_v53, 0.0  ;;  %v1128_v31 = vld [vmem:[%s3616_s12 + $0x68] sm:$0xff]  ;;  %2175 = vmatpush.bf16.msra.mxu3 %v3001_v37 }
 0x204   : > { %v1022_v48 = vpop.f32.mrf.mxu1 }
 0x205   : > { %v3724_v49 = vadd.f32 %v3479_v61, %v1022_v48 }
 0x207   : > { %v1206_v56 = vmul.f32 0.5, %v3724_v49 }
 0x208   : > { %v734_v59 = vpop.f32.mrf.mxu0 }
 0x209   : > { %v3105_v62 = vpop.eup %3104  ;;  %v1297_v1 = vmul.f32 1.442695, %v1206_v56  ;;  %v735_v2 = vadd.f32 %v3730_v52, %v734_v59  ;;  %v3000_v56 = vld [vmem:[%s4645_s8 + $0x20] sm:$0xff] }
 0x20a   : > { %1487 = vrot.lane.b32.xlu2 %v3105_v62, %s3248_s18  ;;  %2176 = vmatpush.bf16.msra.mxu3 %v3000_v56 }
 0x20b   : > { %3106 = vpow2.f32 %v1297_v1  ;;  %v827_v7 = vmax.f32 %v735_v2, 0.0  ;;  %2918 = vmatmul.msk.bf16.gmra.mxu2 %vm1807_vm1, %v1760_v4 }
 0x20c   : > { %v1025_v11 = vpop.f32.mrf.mxu1  ;;  %v1460_v26 = vpop.permute.xlu0 %1459 }
 0x20d   : > { %v868_v18 = vpack.c.bf16 %v827_v7, %v826_v5  ;;  %v3744_v19 = vadd.f32 %v3479_v61, %v1025_v11  ;;  %v1639_v33 = vmul.f32 %v1460_v26, %v1127_v25  ;;  %v2999_v7 = vld [vmem:[%s4645_s8 + $0x18] sm:$0xff] }
 0x20e   : > { %2177 = vmatpush.bf16.msra.mxu3 %v2999_v7 }
 0x20f   : > { %v1207_v20 = vmul.f32 0.5, %v3744_v19  ;;  %1064 = vmatmul.bf16.gmra.mxu1 %v868_v18  ;;  %v1703_v47 = vadd.f32 %v1639_v33, %v3573_v6  ;;  %v2998_v18 = vld [vmem:[%s4645_s8 + $0x10] sm:$0xff] }
 0x210   : > { %v737_v28 = vpop.f32.mrf.mxu0 }
 0x211   : > { %v3107_v29 = vpop.eup %3106  ;;  %v1299_v40 = vmul.f32 1.442695, %v1207_v20  ;;  %v738_v48 = vadd.f32 %v3730_v52, %v737_v28  ;;  %v1129_v20 = vld [vmem:[%s3616_s12 + $0x70] sm:$0xff]  ;;  %v1130_v28 = vld [vmem:[%s3616_s12 + $0x78] sm:$0xff] }
 0x212   : > { %1489 = vrot.lane.b32.xlu0 %v3107_v29, %s3248_s18  ;;  %2178 = vmatpush.bf16.msra.mxu3 %v2998_v18 }
 0x213   : > { %3108 = vpow2.f32 %v1299_v40  ;;  %2872 = vmatmul.msk.bf16.gmra.mxu0 %vm516_vm0, %v479_v21  ;;  %v828_v4 = vmax.f32 %v738_v48, 0.0  ;;  %v1464_v21 = vpop.permute.xlu2 %1463  ;;  %v2997_v40 = vld [vmem:[%s4645_s8 + $0x8] sm:$0xff] }
 0x214   : > { %v1027_v38 = vpop.f32.mrf.mxu1  ;;  %v1462_v39 = vpop.permute.xlu1 %1461  ;;  %v1641_v29 = vmul.f32 %v1464_v21, %v1129_v20  ;;  %v1132_v21 = vld [vmem:[%s3616_s12 + $0x88] sm:$0xff] }
 0x215   : > { %v3758_v41 = vadd.f32 %v3479_v61, %v1027_v38  ;;  %v1640_v45 = vmul.f32 %v1462_v39, %v1128_v31 }
 0x216   : > { %2179 = vmatpush.bf16.msra.mxu3 %v2997_v40  ;;  %v1705_v39 = vadd.f32 %v1641_v29, %v3594_v34 }
 0x217   : > { %4671 = vst [vmem:[#allocation7_spill] sm:$0xff] %v3758_v41  ;;  %v1208_v50 = vmul.f32 0.5, %v3758_v41  ;;  %v1704_v53 = vadd.f32 %v1640_v45, %v3582_v17 }
 0x218   : > { %v739_v57 = vpop.f32.mrf.mxu0 }
 0x219   : > { %v3109_v59 = vpop.eup %3108  ;;  %v1301_v62 = vmul.f32 1.442695, %v1208_v50  ;;  %v740_v1 = vadd.f32 %v3730_v52, %v739_v57  ;;  %v1761_v2 = vpack.c.bf16 %v1704_v53, %v1703_v47  ;;  %v2996_v50 = vld [vmem:[%s4645_s8] sm:$0xff] }
 0x21a   : > { %1491 = vrot.lane.b32.xlu1 %v3109_v59, %s3248_s18  ;;  %2180 = vmatpush.bf16.msra.mxu3 %v2996_v50 }
 0x21b   : > { %3110 = vpow2.f32 %v1301_v62  ;;  %v829_v5 = vmax.f32 %v740_v1, 0.0  ;;  %2919 = vmatmul.msk.bf16.gmra.mxu2 %vm1807_vm1, %v1761_v2 }
 0x21c   : > { %v1030_v8 = vpop.f32.mrf.mxu1 }
 0x21d   : > { %v869_v11 = vpack.c.bf16 %v829_v5, %v828_v4  ;;  %v3774_v12 = vadd.f32 %v3479_v61, %v1030_v8  ;;  %v3802_v5 = vld [vmem:[%s4642_s5] ss:$0 sm:$0xff] }
 0x21f   : > { %v1209_v14 = vmul.f32 0.5, %v3774_v12  ;;  %1069 = vmatmul.bf16.gmra.mxu1 %v869_v11  ;;  %v1131_v11 = vld [vmem:[%s3616_s12 + $0x80] sm:$0xff] }
 0x220   : > { %v742_v24 = vpop.f32.mrf.mxu0 }
 0x221   : > { %v3111_v25 = vpop.eup %3110  ;;  %v1303_v26 = vmul.f32 1.442695, %v1209_v14  ;;  %v743_v45 = vadd.f32 %v3730_v52, %v742_v24  ;;  %v1470_v24 = vpop.permute.xlu2 %1469 }
 0x222   : > { %1493 = vrot.lane.b32.xlu2 %v3111_v25, %s3248_s18 }
 0x223   : > { %3112 = vpow2.f32 %v1303_v26  ;;  %v830_v62 = vmax.f32 %v743_v45, 0.0 }
 0x224   : > { %v1032_v31 = vpop.f32.mrf.mxu1  ;;  %v1466_v33 = vpop.permute.xlu0 %1465 }
 0x225   : > { %v3787_v37 = vadd.f32 %v3479_v61, %v1032_v31  ;;  %v1642_v38 = vmul.f32 %v1466_v33, %v1130_v28  ;;  %v1644_v28 = vmul.f32 %v1470_v24, %v1132_v21  ;;  %v3831_v24 = vld [vmem:[%s4644_s7] ss:$0 sm:$0xff] }
 0x227   : > { %4672 = vst [vmem:[#allocation8_spill] sm:$0xff] %v3787_v37  ;;  %v1210_v47 = vmul.f32 0.5, %v3787_v37  ;;  %v1706_v48 = vadd.f32 %v1642_v38, %v3600_v44 }
 0x228   : > { %v744_v53 = vpop.f32.mrf.mxu0 }
 0x229   : > { %v3113_v56 = vpop.eup %3112  ;;  %v1305_v57 = vmul.f32 1.442695, %v1210_v47  ;;  %v745_v61 = vadd.f32 %v3730_v52, %v744_v53  ;;  %v1762_v59 = vpack.c.bf16 %v1706_v48, %v1705_v39  ;;  %v1708_v39 = vadd.f32 %v1644_v28, %v3624_v13 }
 0x22a   : > { %1495 = vrot.lane.b32.xlu0 %v3113_v56, %s3248_s18 }
 0x22b   : > { %3114 = vpow2.f32 %v1305_v57  ;;  %v831_v1 = vmax.f32 %v745_v61, 0.0  ;;  %2920 = vmatmul.msk.bf16.gmra.mxu2 %vm1807_vm1, %v1762_v59 }
 0x22c   : > { %v1035_v2 = vpop.f32.mrf.mxu1  ;;  %v1468_v14 = vpop.permute.xlu1 %1467 }
 0x22d   : > { %v870_v4 = vpack.c.bf16 %v831_v1, %v830_v62  ;;  %v3805_v7 = vadd.f32 %v3802_v5, %v1035_v2  ;;  %v1643_v26 = vmul.f32 %v1468_v14, %v1131_v11 }
 0x22f   : > { %4673 = vst [vmem:[#allocation9_spill] sm:$0xff] %v3805_v7  ;;  %v1211_v8 = vmul.f32 0.5, %v3805_v7  ;;  %1074 = vmatmul.bf16.gmra.mxu1 %v870_v4  ;;  %v1707_v31 = vadd.f32 %v1643_v26, %v3609_v60  ;;  %v1133_v4 = vld [vmem:[%s3616_s12 + $0x90] sm:$0xff] }
 0x230   : > { %v747_v18 = vpop.f32.mrf.mxu0 }
 0x231   : > { %v3115_v20 = vpop.eup %3114  ;;  %v1307_v25 = vmul.f32 1.442695, %v1211_v8  ;;  %v748_v33 = vadd.f32 %v3730_v52, %v747_v18  ;;  %v1763_v53 = vpack.c.bf16 %v1708_v39, %v1707_v31 }
 0x232   : > { %1497 = vrot.lane.b32.xlu1 %v3115_v20, %s3248_s18  ;;  %v1134_v20 = vld [vmem:[%s3616_s12 + $0x98] sm:$0xff] }
 0x233   : > { %3116 = vpow2.f32 %v1307_v25  ;;  %v832_v56 = vmax.f32 %v748_v33, 0.0 }
 0x234   : > { %v1037_v29 = vpop.f32.mrf.mxu1 }
 0x235   : > { %v3812_v40 = vadd.f32 %v3802_v5, %v1037_v29 }
 0x237   : > { %4674 = vst [vmem:[#allocation10_spill] sm:$0xff] %v3812_v40  ;;  %v1212_v38 = vmul.f32 0.5, %v3812_v40 }
 0x238   : > { %v749_v45 = vpop.f32.mrf.mxu0 }
 0x239   : > { %v3117_v47 = vpop.eup %3116  ;;  %v1309_v48 = vmul.f32 1.442695, %v1212_v38  ;;  %v750_v50 = vadd.f32 %v3730_v52, %v749_v45 }
 0x23a   : > { %1499 = vrot.lane.b32.xlu2 %v3117_v47, %s3248_s18 }
 0x23b   : > { %3118 = vpow2.f32 %v1309_v48  ;;  %v833_v57 = vmax.f32 %v750_v50, 0.0  ;;  %2921 = vmatmul.msk.bf16.gmra.mxu2 %vm1807_vm1, %v1763_v53 }
 0x23c   : > { %v1040_v61 = vpop.f32.mrf.mxu1  ;;  %v1472_v8 = vpop.permute.xlu0 %1471 }
 0x23d   : > { %v871_v59 = vpack.c.bf16 %v833_v57, %v832_v56  ;;  %v3822_v62 = vadd.f32 %v3802_v5, %v1040_v61  ;;  %v1645_v21 = vmul.f32 %v1472_v8, %v1133_v4 }
 0x23e   : > { %v1913_v2 = vpop.f32.mrf.mxu2 }
 0x23f   : > { %4675 = vst [vmem:[#allocation11_spill] sm:$0xff] %v3822_v62  ;;  %v1213_v1 = vmul.f32 0.5, %v3822_v62  ;;  %1079 = vmatmul.bf16.gmra.mxu1 %v871_v59  ;;  %v1709_v31 = vadd.f32 %v1645_v21, %v3636_v36  ;;  %v1914_v47 = vadd.f32 %v3831_v24, %v1913_v2  ;;  %v1476_v21 = vpop.permute.xlu2 %1475 }
 0x240   : > { %v752_v11 = vpop.f32.mrf.mxu0 }
 0x241   : > { %v3119_v14 = vpop.eup %3118  ;;  %v1311_v18 = vmul.f32 1.442695, %v1213_v1  ;;  %v753_v33 = vadd.f32 %v3730_v52, %v752_v11 }
 0x242   : > { %1501 = vrot.lane.b32.xlu0 %v3119_v14, %s3248_s18 }
 0x243   : > { %3120 = vpow2.f32 %v1311_v18  ;;  %v834_v1 = vmax.f32 %v753_v33, 0.0 }
 0x244   : > { %v1042_v25 = vpop.f32.mrf.mxu1  ;;  %v1474_v26 = vpop.permute.xlu1 %1473 }
 0x245   : > { %v3834_v28 = vadd.f32 %v3802_v5, %v1042_v25  ;;  %v1646_v29 = vmul.f32 %v1474_v26, %v1134_v20  ;;  %v1135_v20 = vld [vmem:[%s3616_s12 + $0xa0] sm:$0xff] }
 0x246   : > { %v1915_v45 = vpop.f32.mrf.mxu2  ;;  %v1647_v33 = vmul.f32 %v1476_v21, %v1135_v20 }
 0x247   : > { %4676 = vst [vmem:[#allocation12_spill] sm:$0xff] %v3834_v28  ;;  %v1214_v38 = vmul.f32 0.5, %v3834_v28  ;;  %v1710_v39 = vadd.f32 %v1646_v29, %v3644_v54  ;;  %v1916_v48 = vadd.f32 %v3831_v24, %v1915_v45 }
 0x248   : > { %v754_v50 = vpop.f32.mrf.mxu0 }
 0x249   : > { %v3121_v53 = vpop.eup %3120  ;;  %v1313_v56 = vmul.f32 1.442695, %v1214_v38  ;;  %v755_v57 = vadd.f32 %v3730_v52, %v754_v50  ;;  %v1764_v61 = vpack.c.bf16 %v1710_v39, %v1709_v31  ;;  %v2073_v59 = vpack.c.bf16 %v1916_v48, %v1914_v47  ;;  %v1136_v31 = vld [vmem:[%s3616_s12 + $0xa8] sm:$0xff] }
 0x24a   : > { %1503 = vrot.lane.b32.xlu1 %v3121_v53, %s3248_s18  ;;  %v1711_v48 = vadd.f32 %v1647_v33, %v3656_v16  ;;  %v1137_v33 = vld [vmem:[%s3616_s12 + $0xb0] sm:$0xff] }
 0x24b   : > { %3122 = vpow2.f32 %v1313_v56  ;;  %v835_v4 = vmax.f32 %v755_v57, 0.0  ;;  %2922 = vmatmul.msk.bf16.gmra.mxu2 %vm1807_vm1, %v1764_v61  ;;  %2181 = vmatmul.bf16.vlgmr.msra.gmra.mxu3 %v2073_v59 }
 0x24c   : > { %v1045_v2 = vpop.f32.mrf.mxu1 }
 0x24d   : > { %v872_v8 = vpack.c.bf16 %v835_v4, %v834_v1  ;;  %v3846_v11 = vadd.f32 %v3802_v5, %v1045_v2 }
 0x24e   : > { %v1918_v18 = vpop.f32.mrf.mxu2 }
 0x24f   : > { %4677 = vst [vmem:[#allocation13_spill] sm:$0xff] %v3846_v11  ;;  %v1215_v14 = vmul.f32 0.5, %v3846_v11  ;;  %1084 = vmatmul.bf16.gmra.mxu1 %v872_v8  ;;  %v1919_v61 = vadd.f32 %v3831_v24, %v1918_v18 }
 0x250   : > { %v757_v25 = vpop.f32.mrf.mxu0 }
 0x251   : > { %v3123_v26 = vpop.eup %3122  ;;  %v1315_v29 = vmul.f32 1.442695, %v1215_v14  ;;  %v758_v50 = vadd.f32 %v3730_v52, %v757_v25 }
 0x252   : > { %1505 = vrot.lane.b32.xlu2 %v3123_v26, %s3248_s18 }
 0x253   : > { %3124 = vpow2.f32 %v1315_v29  ;;  %v836_v21 = vmax.f32 %v758_v50, 0.0  ;;  %v1482_v50 = vpop.permute.xlu2 %1481 }
 0x254   : > { %v1047_v38 = vpop.f32.mrf.mxu1  ;;  %v1478_v39 = vpop.permute.xlu0 %1477 }
 0x255   : > { %v3853_v45 = vadd.f32 %v3802_v5, %v1047_v38  ;;  %v1648_v47 = vmul.f32 %v1478_v39, %v1136_v31 }
 0x256   : > { %v1920_v57 = vpop.f32.mrf.mxu2 }
 0x257   : > { %4678 = vst [vmem:[#allocation14_spill] sm:$0xff] %v3853_v45  ;;  %v1216_v53 = vmul.f32 0.5, %v3853_v45  ;;  %v1712_v56 = vadd.f32 %v1648_v47, %v3664_v35  ;;  %v1921_v59 = vadd.f32 %v3831_v24, %v1920_v57 }
 0x258   : > { %v759_v1 = vpop.f32.mrf.mxu0 }
 0x259   : > { %v3125_v4 = vpop.eup %3124  ;;  %v1317_v2 = vmul.f32 1.442695, %v1216_v53  ;;  %v760_v8 = vadd.f32 %v3730_v52, %v759_v1  ;;  %v1765_v14 = vpack.c.bf16 %v1712_v56, %v1711_v48  ;;  %v2074_v20 = vpack.c.bf16 %v1921_v59, %v1919_v61  ;;  %v1138_v53 = vld [vmem:[%s3616_s12 + $0xb8] sm:$0xff] }
 0x25a   : > { %1507 = vrot.lane.b32.xlu0 %v3125_v4, %s3248_s18  ;;  %v1650_v61 = vmul.f32 %v1482_v50, %v1138_v53 }
 0x25b   : > { %3126 = vpow2.f32 %v1317_v2  ;;  %v837_v25 = vmax.f32 %v760_v8, 0.0  ;;  %2923 = vmatmul.msk.bf16.gmra.mxu2 %vm1807_vm1, %v1765_v14  ;;  %2186 = vmatmul.bf16.gmra.mxu3 %v2074_v20 }
 0x25c   : > { %v1050_v18 = vpop.f32.mrf.mxu1  ;;  %v1480_v38 = vpop.permute.xlu1 %1479  ;;  %v1714_v20 = vadd.f32 %v1650_v61, %v3684_v15 }
 0x25d   : > { %v873_v26 = vpack.c.bf16 %v837_v25, %v836_v21  ;;  %v3865_v29 = vadd.f32 %v3802_v5, %v1050_v18  ;;  %v1649_v57 = vmul.f32 %v1480_v38, %v1137_v33 }
 0x25e   : > { %v1923_v39 = vpop.f32.mrf.mxu2 }
 0x25f   : > { %4679 = vst [vmem:[#allocation15_spill] sm:$0xff] %v3865_v29  ;;  %v1217_v31 = vmul.f32 0.5, %v3865_v29  ;;  %1089 = vmatmul.bf16.gmra.mxu1 %v873_v26  ;;  %v1713_v4 = vadd.f32 %v1649_v57, %v3676_v58  ;;  %v1924_v21 = vadd.f32 %v3831_v24, %v1923_v39 }
 0x260   : > { %v762_v47 = vpop.f32.mrf.mxu0 }
 0x261   : > { %v3127_v48 = vpop.eup %3126  ;;  %v1319_v56 = vmul.f32 1.442695, %v1217_v31  ;;  %v763_v2 = vadd.f32 %v3730_v52, %v762_v47  ;;  %v1766_v38 = vpack.c.bf16 %v1714_v20, %v1713_v4  ;;  %v1140_v20 = vld [vmem:[%s3616_s12 + $0xc8] sm:$0xff] }
 0x262   : > { %1509 = vrot.lane.b32.xlu1 %v3127_v48, %s3248_s18 }
 0x263   : > { %3128 = vpow2.f32 %v1319_v56  ;;  %v838_v47 = vmax.f32 %v763_v2, 0.0 }
 0x264   : > { %v1052_v59 = vpop.f32.mrf.mxu1 }
 0x265   : > { %v3872_v1 = vadd.f32 %v3802_v5, %v1052_v59  ;;  %v1139_v59 = vld [vmem:[%s3616_s12 + $0xc0] sm:$0xff] }
 0x266   : > { %v1925_v14 = vpop.f32.mrf.mxu2 }
 0x267   : > { %4680 = vst [vmem:[#allocation16_spill] sm:$0xff] %v3872_v1  ;;  %v1218_v8 = vmul.f32 0.5, %v3872_v1  ;;  %v1926_v25 = vadd.f32 %v3831_v24, %v1925_v14 }
 0x268   : > { %v764_v18 = vpop.f32.mrf.mxu0 }
 0x269   : > { %v3129_v26 = vpop.eup %3128  ;;  %v1321_v31 = vmul.f32 1.442695, %v1218_v8  ;;  %v765_v33 = vadd.f32 %v3730_v52, %v764_v18  ;;  %v2075_v48 = vpack.c.bf16 %v1926_v25, %v1924_v21 }
 0x26a   : > { %1511 = vrot.lane.b32.xlu2 %v3129_v26, %s3248_s18 }
 0x26b   : > { %3130 = vpow2.f32 %v1321_v31  ;;  %v839_v53 = vmax.f32 %v765_v33, 0.0  ;;  %2924 = vmatmul.msk.bf16.gmra.mxu2 %vm1807_vm1, %v1766_v38  ;;  %2191 = vmatmul.bf16.gmra.mxu3 %v2075_v48 }
 0x26c   : > { %v1055_v39 = vpop.f32.mrf.mxu1  ;;  %v1484_v8 = vpop.permute.xlu0 %1483 }
 0x26d   : > { %v874_v50 = vpack.c.bf16 %v839_v53, %v838_v47  ;;  %v3884_v56 = vadd.f32 %v3802_v5, %v1055_v39  ;;  %v1651_v21 = vmul.f32 %v1484_v8, %v1139_v59 }
 0x26e   : > { %v1928_v61 = vpop.f32.mrf.mxu2 }
 0x26f   : > { %4681 = vst [vmem:[#allocation17_spill] sm:$0xff] %v3884_v56  ;;  %v1219_v57 = vmul.f32 0.5, %v3884_v56  ;;  %1094 = vmatmul.bf16.gmra.mxu1 %v874_v50  ;;  %v1715_v33 = vadd.f32 %v1651_v21, %v3696_v42  ;;  %v1929_v39 = vadd.f32 %v3831_v24, %v1928_v61 }
 0x270   : > { %v767_v4 = vpop.f32.mrf.mxu0 }
 0x271   : > { %v3131_v14 = vpop.eup %3130  ;;  %v1323_v2 = vmul.f32 1.442695, %v1219_v57  ;;  %v768_v38 = vadd.f32 %v3730_v52, %v767_v4 }
 0x272   : > { %1513 = vrot.lane.b32.xlu0 %v3131_v14, %s3248_s18 }
 0x273   : > { %3132 = vpow2.f32 %v1323_v2  ;;  %v840_v4 = vmax.f32 %v768_v38, 0.0 }
 0x274   : > { %v1057_v25 = vpop.f32.mrf.mxu1  ;;  %v1486_v18 = vpop.permute.xlu1 %1485 }
 0x275   : > { %v3891_v26 = vadd.f32 %v3802_v5, %v1057_v25  ;;  %v1652_v31 = vmul.f32 %v1486_v18, %v1140_v20 }
 0x276   : > { %v1930_v53 = vpop.f32.mrf.mxu2 }
 0x277   : > { %4682 = vst [vmem:[#allocation18_spill] sm:$0xff] %v3891_v26  ;;  %v1220_v48 = vmul.f32 0.5, %v3891_v26  ;;  %v1716_v47 = vadd.f32 %v1652_v31, %v3704_v63  ;;  %v1931_v50 = vadd.f32 %v3831_v24, %v1930_v53 }
 0x278   : > { %v769_v57 = vpop.f32.mrf.mxu0 }
 0x279   : > { %v3133_v59 = vpop.eup %3132  ;;  %v1325_v8 = vmul.f32 1.442695, %v1220_v48  ;;  %v1767_v14 = vpack.c.bf16 %v1716_v47, %v1715_v33  ;;  %v770_v2 = vadd.f32 %v3730_v52, %v769_v57  ;;  %v2076_v20 = vpack.c.bf16 %v1931_v50, %v1929_v39  ;;  %v1141_v48 = vld [vmem:[%s3616_s12 + $0xd0] sm:$0xff]  ;;  %v1488_v47 = vpop.permute.xlu2 %1487  ;;  %v1142_v50 = vld [vmem:[%s3616_s12 + $0xd8] sm:$0xff] }
 0x27a   : > { %1515 = vrot.lane.b32.xlu1 %v3133_v59, %s3248_s18  ;;  %v1653_v57 = vmul.f32 %v1488_v47, %v1141_v48 }
 0x27b   : > { %3134 = vpow2.f32 %v1325_v8  ;;  %v841_v21 = vmax.f32 %v770_v2, 0.0  ;;  %2925 = vmatmul.msk.bf16.gmra.mxu2 %vm1807_vm1, %v1767_v14  ;;  %2196 = vmatmul.bf16.gmra.mxu3 %v2076_v20 }
 0x27c   : > { %v1060_v61 = vpop.f32.mrf.mxu1  ;;  %v1717_v20 = vadd.f32 %v1653_v57, %v3716_v27 }
 0x27d   : > { %v875_v25 = vpack.c.bf16 %v841_v21, %v840_v4  ;;  %v3903_v18 = vadd.f32 %v3802_v5, %v1060_v61 }
 0x27e   : > { %v1933_v33 = vpop.f32.mrf.mxu2 }
 0x27f   : > { %4683 = vst [vmem:[#allocation19_spill] sm:$0xff] %v3903_v18  ;;  %v1221_v31 = vmul.f32 0.5, %v3903_v18  ;;  %1099 = vmatmul.bf16.gmra.mxu1 %v875_v25 }
 0x280   : > { %v772_v53 = vpop.f32.mrf.mxu0 }
 0x281   : > { %v3135_v39 = vpop.eup %3134  ;;  %v1327_v38 = vmul.f32 1.442695, %v1221_v31  ;;  %v773_v4 = vadd.f32 %v3730_v52, %v772_v53  ;;  %v1934_v31 = vadd.f32 %v3831_v24, %v1933_v33 }
 0x282   : > { %1517 = vrot.lane.b32.xlu2 %v3135_v39, %s3248_s18 }
 0x283   : > { %3136 = vpow2.f32 %v1327_v38  ;;  %v842_v53 = vmax.f32 %v773_v4, 0.0  ;;  %v1494_v4 = vpop.permute.xlu2 %1493 }
 0x284   : > { %v1062_v59 = vpop.f32.mrf.mxu1  ;;  %v1490_v8 = vpop.permute.xlu0 %1489 }
 0x285   : > { %v3910_v14 = vadd.f32 %v3802_v5, %v1062_v59  ;;  %v1654_v2 = vmul.f32 %v1490_v8, %v1142_v50 }
 0x286   : > { %v1935_v25 = vpop.f32.mrf.mxu2 }
 0x287   : > { %4684 = vst [vmem:[#allocation20_spill] sm:$0xff] %v3910_v14  ;;  %v1222_v21 = vmul.f32 0.5, %v3910_v14  ;;  %v1718_v61 = vadd.f32 %v1654_v2, %v3724_v49  ;;  %v1936_v48 = vadd.f32 %v3831_v24, %v1935_v25 }
 0x288   : > { %v774_v47 = vpop.f32.mrf.mxu0 }
 0x289   : > { %v3137_v39 = vpop.eup %3136  ;;  %v1329_v38 = vmul.f32 1.442695, %v1222_v21  ;;  %v1768_v59 = vpack.c.bf16 %v1718_v61, %v1717_v20  ;;  %v775_v50 = vadd.f32 %v3730_v52, %v774_v47  ;;  %v2077_v57 = vpack.c.bf16 %v1936_v48, %v1934_v31  ;;  %v1143_v20 = vld [vmem:[%s3616_s12 + $0xe0] sm:$0xff]  ;;  %v1144_v48 = vld [vmem:[%s3616_s12 + $0xe8] sm:$0xff] }
 0x28a   : > { %1519 = vrot.lane.b32.xlu0 %v3137_v39, %s3248_s18 }
 0x28b   : > { %3138 = vpow2.f32 %v1329_v38  ;;  %v843_v8 = vmax.f32 %v775_v50, 0.0  ;;  %2926 = vmatmul.msk.bf16.gmra.mxu2 %vm1807_vm1, %v1768_v59  ;;  %2201 = vmatmul.bf16.gmra.mxu3 %v2077_v57  ;;  %v1656_v59 = vmul.f32 %v1494_v4, %v1144_v48 }
 0x28c   : > { %v1065_v33 = vpop.f32.mrf.mxu1  ;;  %v1492_v61 = vpop.permute.xlu1 %1491 }
 0x28d   : > { %v876_v2 = vpack.c.bf16 %v843_v8, %v842_v53  ;;  %v3922_v25 = vadd.f32 %v3802_v5, %v1065_v33  ;;  %v1655_v50 = vmul.f32 %v1492_v61, %v1143_v20  ;;  %v1720_v15 = vadd.f32 %v1656_v59, %v3758_v41 }
 0x28e   : > { %v1938_v47 = vpop.f32.mrf.mxu2 }
 0x28f   : > { %4685 = vst [vmem:[#allocation21_spill] sm:$0xff] %v3922_v25  ;;  %v1223_v21 = vmul.f32 0.5, %v3922_v25  ;;  %1104 = vmatmul.bf16.gmra.mxu1 %v876_v2  ;;  %v1719_v8 = vadd.f32 %v1655_v50, %v3744_v19 }
 0x290   : > { %v777_v39 = vpop.f32.mrf.mxu0 }
 0x291   : > { %v3139_v31 = vpop.eup %3138  ;;  %v1331_v38 = vmul.f32 1.442695, %v1223_v21  ;;  %v778_v33 = vadd.f32 %v3730_v52, %v777_v39  ;;  %v1939_v21 = vadd.f32 %v3831_v24, %v1938_v47 }
 0x292   : > { %1521 = vrot.lane.b32.xlu1 %v3139_v31, %s3248_s18 }
 0x293   : > { %3140 = vpow2.f32 %v1331_v38  ;;  %v1769_v38 = vpack.c.bf16 %v1720_v15, %v1719_v8  ;;  %v844_v39 = vmax.f32 %v778_v33, 0.0  ;;  %v1145_v15 = vld [vmem:[%s3616_s12 + $0xf0] sm:$0xff]  ;;  %v1146_v33 = vld [vmem:[%s3616_s12 + $0xf8] sm:$0xff] }
 0x294   : > { %v1067_v57 = vpop.f32.mrf.mxu1 }
 0x295   : > { %v3929_v53 = vadd.f32 %v3802_v5, %v1067_v57 }
 0x296   : > { %v1940_v27 = vpop.f32.mrf.mxu2 }
 0x297   : > { %v1224_v2 = vmul.f32 0.5, %v3929_v53  ;;  %v1941_v20 = vadd.f32 %v3831_v24, %v1940_v27 }
 0x298   : > { %v779_v61 = vpop.f32.mrf.mxu0 }
 0x299   : > { %v3141_v31 = vpop.eup %3140  ;;  %v1333_v48 = vmul.f32 1.442695, %v1224_v2  ;;  %v780_v4 = vadd.f32 %v3730_v52, %v779_v61  ;;  %v2078_v50 = vpack.c.bf16 %v1941_v20, %v1939_v21 }
 0x29a   : > { %1523 = vrot.lane.b32.xlu2 %v3141_v31, %s3248_s18 }
 0x29b   : > { %3142 = vpow2.f32 %v1333_v48  ;;  %v845_v57 = vmax.f32 %v780_v4, 0.0  ;;  %2927 = vmatmul.msk.bf16.gmra.mxu2 %vm1807_vm1, %v1769_v38  ;;  %2206 = vmatmul.bf16.gmra.mxu3 %v2078_v50 }
 0x29c   : > { %v1070_v47 = vpop.f32.mrf.mxu1  ;;  %v1496_v52 = vpop.permute.xlu0 %1495 }
 0x29d   : > { %v877_v59 = vpack.c.bf16 %v845_v57, %v844_v39  ;;  %v3941_v27 = vadd.f32 %v3802_v5, %v1070_v47  ;;  %v1657_v20 = vmul.f32 %v1496_v52, %v1145_v15 }
 0x29e   : > { %v1943_v41 = vpop.f32.mrf.mxu2 }
 0x29f   : > { %v1225_v2 = vmul.f32 0.5, %v3941_v27  ;;  %1109 = vmatmul.bf16.gmra.mxu1 %v877_v59  ;;  %v1721_v38 = vadd.f32 %v1657_v20, %v3774_v12  ;;  %v1944_v47 = vadd.f32 %v3831_v24, %v1943_v41 }
 0x2a1   : > { %v3143_v8 = vpop.eup %3142  ;;  %v1335_v21 = vmul.f32 1.442695, %v1225_v2 }
 0x2a2   : > { %1525 = vrot.lane.b32.xlu0 %v3143_v8, %s3248_s18 }
 0x2a3   : > { %3144 = vpow2.f32 %v1335_v21 }
 0x2a4   : > { %v1072_v61 = vpop.f32.mrf.mxu1  ;;  %v1498_v31 = vpop.permute.xlu1 %1497 }
 0x2a5   : > { %v3948_v48 = vadd.f32 %v3802_v5, %v1072_v61  ;;  %v1658_v4 = vmul.f32 %v1498_v31, %v1146_v33  ;;  %v1147_v61 = vld [vmem:[%s3616_s12 + $0x100] sm:$0xff]  ;;  %v1500_v31 = vpop.permute.xlu2 %1499 }
 0x2a6   : > { %v1945_v57 = vpop.f32.mrf.mxu2 }
 0x2a7   : > { %v1226_v50 = vmul.f32 0.5, %v3948_v48  ;;  %v1722_v39 = vadd.f32 %v1658_v4, %v3787_v37  ;;  %v1946_v59 = vadd.f32 %v3831_v24, %v1945_v57 }
 0x2a9   : > { %v3145_v2 = vpop.eup %3144  ;;  %v1337_v15 = vmul.f32 1.442695, %v1226_v50  ;;  %v1770_v52 = vpack.c.bf16 %v1722_v39, %v1721_v38  ;;  %v2079_v8 = vpack.c.bf16 %v1946_v59, %v1944_v47  ;;  %v1148_v38 = vld [vmem:[%s3616_s12 + $0x108] sm:$0xff]  ;;  %v1659_v39 = vmul.f32 %v1500_v31, %v1147_v61 }
 0x2aa   : > { %1527 = vrot.lane.b32.xlu1 %v3145_v2, %s3248_s18 }
 0x2ab   : > { %3146 = vpow2.f32 %v1337_v15  ;;  %2928 = vmatmul.msk.bf16.gmra.mxu2 %vm1807_vm1, %v1770_v52  ;;  %2211 = vmatmul.bf16.gmra.mxu3 %v2079_v8  ;;  %v1723_v15 = vadd.f32 %v1659_v39, %v3805_v7 }
 0x2ac   : > { %v1075_v21 = vpop.f32.mrf.mxu1 }
 0x2ad   : > { %v3958_v33 = vadd.f32 %v3802_v5, %v1075_v21 }
 0x2ae   : > { %v1948_v41 = vpop.f32.mrf.mxu2 }
 0x2af   : > { %v1227_v20 = vmul.f32 0.5, %v3958_v33 }
 0x2b1   : > { %v3147_v4 = vpop.eup %3146  ;;  %v1339_v50 = vmul.f32 1.442695, %v1227_v20  ;;  %v1949_v20 = vadd.f32 %v3831_v24, %v1948_v41  ;;  %v1149_v41 = vld [vmem:[%s3616_s12 + $0x110] sm:$0xff] }
 0x2b2   : > { %1529 = vrot.lane.b32.xlu2 %v3147_v4, %s3248_s18 }
 0x2b3   : > { %3148 = vpow2.f32 %v1339_v50 }
 0x2b4   : > { %v1077_v57 = vpop.f32.mrf.mxu1  ;;  %v1502_v47 = vpop.permute.xlu0 %1501 }
 0x2b5   : > { %v3965_v59 = vadd.f32 %v3802_v5, %v1077_v57  ;;  %v1660_v2 = vmul.f32 %v1502_v47, %v1148_v38 }
 0x2b6   : > { %v1950_v21 = vpop.f32.mrf.mxu2 }
 0x2b7   : > { %v1228_v52 = vmul.f32 0.5, %v3965_v59  ;;  %v1724_v8 = vadd.f32 %v1660_v2, %v3812_v40  ;;  %v1951_v4 = vadd.f32 %v3831_v24, %v1950_v21  ;;  %v1150_v40 = vld [vmem:[%s3616_s12 + $0x118] sm:$0xff] }
 0x2b9   : > { %v3149_v61 = vpop.eup %3148  ;;  %v1341_v31 = vmul.f32 1.442695, %v1228_v52  ;;  %v1771_v50 = vpack.c.bf16 %v1724_v8, %v1723_v15  ;;  %v2080_v57 = vpack.c.bf16 %v1951_v4, %v1949_v20  ;;  %v1506_v52 = vpop.permute.xlu2 %1505 }
 0x2ba   : > { %1531 = vrot.lane.b32.xlu0 %v3149_v61, %s3248_s18  ;;  %v1662_v20 = vmul.f32 %v1506_v52, %v1150_v40 }
 0x2bb   : > { %3150 = vpow2.f32 %v1341_v31  ;;  %2929 = vmatmul.msk.bf16.gmra.mxu2 %vm1807_vm1, %v1771_v50  ;;  %2216 = vmatmul.bf16.gmra.mxu3 %v2080_v57 }
 0x2bc   : > { %v1080_v38 = vpop.f32.mrf.mxu1  ;;  %v1504_v2 = vpop.permute.xlu1 %1503 }
 0x2bd   : > { %v3975_v39 = vadd.f32 %v3802_v5, %v1080_v38  ;;  %v1661_v8 = vmul.f32 %v1504_v2, %v1149_v41  ;;  %v1726_v38 = vadd.f32 %v1662_v20, %v3834_v28 }
 0x2be   : > { %v1953_v21 = vpop.f32.mrf.mxu2 }
 0x2bf   : > { %v1229_v47 = vmul.f32 0.5, %v3975_v39  ;;  %v1725_v31 = vadd.f32 %v1661_v8, %v3822_v62  ;;  %v1954_v37 = vadd.f32 %v3831_v24, %v1953_v21 }
 0x2c1   : > { %v3151_v7 = vpop.eup %3150  ;;  %v1343_v15 = vmul.f32 1.442695, %v1229_v47  ;;  %v1772_v2 = vpack.c.bf16 %v1726_v38, %v1725_v31 }
 0x2c2   : > { %1533 = vrot.lane.b32.xlu1 %v3151_v7, %s3248_s18 }
 0x2c3   : > { %3152 = vpow2.f32 %v1343_v15 }
 0x2c4   : > { %v1082_v4 = vpop.f32.mrf.mxu1 }
 0x2c5   : > { %v3982_v61 = vadd.f32 %v3802_v5, %v1082_v4  ;;  %v1151_v4 = vld [vmem:[%s3616_s12 + $0x120] sm:$0xff] }
 0x2c6   : > { %v1955_v57 = vpop.f32.mrf.mxu2 }
 0x2c7   : > { %v1230_v50 = vmul.f32 0.5, %v3982_v61  ;;  %v1956_v47 = vadd.f32 %v3831_v24, %v1955_v57 }
 0x2c9   : > { %v3153_v41 = vpop.eup %3152  ;;  %v1345_v7 = vmul.f32 1.442695, %v1230_v50  ;;  %v2081_v40 = vpack.c.bf16 %v1956_v47, %v1954_v37  ;;  %v1152_v37 = vld [vmem:[%s3616_s12 + $0x128] sm:$0xff] }
 0x2ca   : > { %1535 = vrot.lane.b32.xlu2 %v3153_v41, %s3248_s18 }
 0x2cb   : > { %3154 = vpow2.f32 %v1345_v7  ;;  %2930 = vmatmul.msk.bf16.gmra.mxu2 %vm1807_vm1, %v1772_v2  ;;  %2221 = vmatmul.bf16.gmra.mxu3 %v2081_v40 }
 0x2cc   : > { %v1085_v52 = vpop.f32.mrf.mxu1  ;;  %v1508_v50 = vpop.permute.xlu0 %1507 }
 0x2cd   : > { %v3992_v15 = vadd.f32 %v3802_v5, %v1085_v52  ;;  %v1663_v38 = vmul.f32 %v1508_v50, %v1151_v4 }
 0x2ce   : > { %v1958_v21 = vpop.f32.mrf.mxu2  ;;  %v3995_v20 = vpop.f32.mrf.mxu3 }
 0x2cf   : > { %v1231_v8 = vmul.f32 0.5, %v3992_v15  ;;  %4686 = vst [vmem:[#allocation22_spill] sm:$0xff] %v3995_v20  ;;  %v1727_v40 = vadd.f32 %v1663_v38, %v3846_v11 }
 0x2d1   : > { %v3155_v31 = vpop.eup %3154  ;;  %v1347_v57 = vmul.f32 1.442695, %v1231_v8  ;;  %v1959_v8 = vadd.f32 %v3831_v24, %v1958_v21 }
 0x2d2   : > { %1537 = vrot.lane.b32.xlu0 %v3155_v31, %s3248_s18 }
 0x2d3   : > { %3156 = vpow2.f32 %v1347_v57 }
 0x2d4   : > { %v1087_v47 = vpop.f32.mrf.mxu1  ;;  %v1510_v41 = vpop.permute.xlu1 %1509 }
 0x2d5   : > { %v4001_v7 = vadd.f32 %v3802_v5, %v1087_v47  ;;  %v1664_v2 = vmul.f32 %v1510_v41, %v1152_v37 }
 0x2d6   : > { %v1960_v28 = vpop.f32.mrf.mxu2  ;;  %v4006_v62 = vpop.f32.mrf.mxu3 }
 0x2d7   : > { %v1232_v52 = vmul.f32 0.5, %v4001_v7  ;;  %v1728_v20 = vadd.f32 %v1664_v2, %v3853_v45  ;;  %4687 = vst [vmem:[#allocation23_spill] sm:$0xff] %v4006_v62  ;;  %v1961_v4 = vadd.f32 %v3831_v24, %v1960_v28  ;;  %v1153_v28 = vld [vmem:[%s3616_s12 + $0x130] sm:$0xff] }
 0x2d9   : > { %v3157_v50 = vpop.eup %3156  ;;  %v1349_v31 = vmul.f32 1.442695, %v1232_v52  ;;  %v1773_v57 = vpack.c.bf16 %v1728_v20, %v1727_v40  ;;  %v2082_v37 = vpack.c.bf16 %v1961_v4, %v1959_v8  ;;  %v1512_v52 = vpop.permute.xlu2 %1511  ;;  %v1154_v8 = vld [vmem:[%s3616_s12 + $0x138] sm:$0xff] }
 0x2da   : > { %1539 = vrot.lane.b32.xlu1 %v3157_v50, %s3248_s18  ;;  %v1665_v4 = vmul.f32 %v1512_v52, %v1153_v28 }
 0x2db   : > { %3158 = vpow2.f32 %v1349_v31  ;;  %2931 = vmatmul.msk.bf16.gmra.mxu2 %vm1807_vm1, %v1773_v57  ;;  %2226 = vmatmul.bf16.gmra.mxu3 %v2082_v37 }
 0x2dc   : > { %v1090_v38 = vpop.f32.mrf.mxu1 }
 0x2dd   : > { %v4013_v47 = vadd.f32 %v3802_v5, %v1090_v38  ;;  %v1729_v38 = vadd.f32 %v1665_v4, %v3865_v29 }
 0x2de   : > { %v1963_v21 = vpop.f32.mrf.mxu2  ;;  %v4016_v2 = vpop.f32.mrf.mxu3 }
 0x2df   : > { %v1233_v41 = vmul.f32 0.5, %v4013_v47  ;;  %4688 = vst [vmem:[#allocation24_spill] sm:$0xff] %v4016_v2 }
 0x2e1   : > { %v3159_v20 = vpop.eup %3158  ;;  %v1351_v40 = vmul.f32 1.442695, %v1233_v41 }
 0x2e2   : > { %1541 = vrot.lane.b32.xlu2 %v3159_v20, %s3248_s18  ;;  %v1964_v20 = vadd.f32 %v3831_v24, %v1963_v21 }
 0x2e3   : > { %3160 = vpow2.f32 %v1351_v40 }
 0x2e4   : > { %v1092_v50 = vpop.f32.mrf.mxu1  ;;  %v1514_v31 = vpop.permute.xlu0 %1513 }
 0x2e5   : > { %v4022_v57 = vadd.f32 %v3802_v5, %v1092_v50  ;;  %v1666_v37 = vmul.f32 %v1514_v31, %v1154_v8 }
 0x2e6   : > { %v1965_v62 = vpop.f32.mrf.mxu2  ;;  %v4027_v41 = vpop.f32.mrf.mxu3 }
 0x2e7   : > { %v1234_v45 = vmul.f32 0.5, %v4022_v57  ;;  %v1730_v2 = vadd.f32 %v1666_v37, %v3872_v1  ;;  %4689 = vst [vmem:[#allocation25_spill] sm:$0xff] %v4027_v41  ;;  %v1966_v28 = vadd.f32 %v3831_v24, %v1965_v62  ;;  %v1155_v41 = vld [vmem:[%s3616_s12 + $0x140] sm:$0xff] }
 0x2e9   : > { %v3161_v52 = vpop.eup %3160  ;;  %v1353_v40 = vmul.f32 1.442695, %v1234_v45  ;;  %v1774_v50 = vpack.c.bf16 %v1730_v2, %v1729_v38  ;;  %v2083_v8 = vpack.c.bf16 %v1966_v28, %v1964_v20  ;;  %v1156_v2 = vld [vmem:[%s3616_s12 + $0x148] sm:$0xff]  ;;  %v1518_v38 = vpop.permute.xlu2 %1517 }
 0x2ea   : > { %1543 = vrot.lane.b32.xlu0 %v3161_v52, %s3248_s18  ;;  %v1668_v28 = vmul.f32 %v1518_v38, %v1156_v2 }
 0x2eb   : > { %3162 = vpow2.f32 %v1353_v40  ;;  %2932 = vmatmul.msk.bf16.gmra.mxu2 %vm1807_vm1, %v1774_v50  ;;  %2231 = vmatmul.bf16.gmra.mxu3 %v2083_v8 }
 0x2ec   : > { %v1095_v4 = vpop.f32.mrf.mxu1  ;;  %v1516_v37 = vpop.permute.xlu1 %1515 }
 0x2ed   : > { %v4034_v31 = vadd.f32 %v3802_v5, %v1095_v4  ;;  %v1667_v20 = vmul.f32 %v1516_v37, %v1155_v41 }
 0x2ee   : > { %v1968_v62 = vpop.f32.mrf.mxu2  ;;  %v4038_v29 = vpop.f32.mrf.mxu3 }
 0x2ef   : > { %v1235_v21 = vmul.f32 0.5, %v4034_v31  ;;  %4690 = vst [vmem:[#allocation26_spill] sm:$0xff] %v4038_v29  ;;  %v1731_v8 = vadd.f32 %v1667_v20, %v3884_v56  ;;  %v1732_v29 = vadd.f32 %v1668_v28, %v3891_v26  ;;  %v1969_v41 = vadd.f32 %v3831_v24, %v1968_v62 }
 0x2f1   : > { %v3163_v45 = vpop.eup %3162  ;;  %v1355_v52 = vmul.f32 1.442695, %v1235_v21  ;;  %v1775_v2 = vpack.c.bf16 %v1732_v29, %v1731_v8 }
 0x2f2   : > { %1545 = vrot.lane.b32.xlu1 %v3163_v45, %s3248_s18 }
 0x2f3   : > { %3164 = vpow2.f32 %v1355_v52 }
 0x2f4   : > { %v1097_v40 = vpop.f32.mrf.mxu1 }
 0x2f5   : > { %v4043_v50 = vadd.f32 %v3802_v5, %v1097_v40 }
 0x2f6   : > { %v1970_v1 = vpop.f32.mrf.mxu2  ;;  %v4047_v11 = vpop.f32.mrf.mxu3 }
 0x2f7   : > { %v1236_v4 = vmul.f32 0.5, %v4043_v50  ;;  %4691 = vst [vmem:[#allocation27_spill] sm:$0xff] %v4047_v11  ;;  %v1971_v37 = vadd.f32 %v3831_v24, %v1970_v1  ;;  %v1157_v1 = vld [vmem:[%s3616_s12 + $0x150] sm:$0xff] }
 0x2f9   : > { %v3165_v21 = vpop.eup %3164  ;;  %v1357_v45 = vmul.f32 1.442695, %v1236_v4  ;;  %v2084_v38 = vpack.c.bf16 %v1971_v37, %v1969_v41  ;;  %v1158_v41 = vld [vmem:[%s3616_s12 + $0x158] sm:$0xff] }
 0x2fa   : > { %1547 = vrot.lane.b32.xlu2 %v3165_v21, %s3248_s18 }
 0x2fb   : > { %3166 = vpow2.f32 %v1357_v45  ;;  %2933 = vmatmul.msk.bf16.gmra.mxu2 %vm1807_vm1, %v1775_v2  ;;  %2236 = vmatmul.bf16.gmra.mxu3 %v2084_v38 }
 0x2fc   : > { %v1100_v52 = vpop.f32.mrf.mxu1  ;;  %v1520_v4 = vpop.permute.xlu0 %1519 }
 0x2fd   : > { %v4055_v20 = vadd.f32 %v3802_v5, %v1100_v52  ;;  %v1669_v37 = vmul.f32 %v1520_v4, %v1157_v1 }
 0x2fe   : > { %v1973_v62 = vpop.f32.mrf.mxu2  ;;  %v4058_v40 = vpop.f32.mrf.mxu3 }
 0x2ff   : > { %v1237_v28 = vmul.f32 0.5, %v4055_v20  ;;  %4692 = vst [vmem:[#allocation28_spill] sm:$0xff] %v4058_v40  ;;  %v1733_v52 = vadd.f32 %v1669_v37, %v3903_v18 }
 0x301   : > { %v3167_v29 = vpop.eup %3166  ;;  %v1359_v8 = vmul.f32 1.442695, %v1237_v28  ;;  %v1974_v28 = vadd.f32 %v3831_v24, %v1973_v62 }
 0x302   : > { %1549 = vrot.lane.b32.xlu0 %v3167_v29, %s3248_s18 }
 0x303   : > { %3168 = vpow2.f32 %v1359_v8 }
 0x304   : > { %v1102_v21 = vpop.f32.mrf.mxu1  ;;  %v1522_v45 = vpop.permute.xlu1 %1521 }
 0x305   : > { %v4064_v2 = vadd.f32 %v3802_v5, %v1102_v21  ;;  %v1670_v38 = vmul.f32 %v1522_v45, %v1158_v41 }
 0x306   : > { %v1975_v26 = vpop.f32.mrf.mxu2  ;;  %v4069_v56 = vpop.f32.mrf.mxu3 }
 0x307   : > { %v1238_v11 = vmul.f32 0.5, %v4064_v2  ;;  %v1734_v40 = vadd.f32 %v1670_v38, %v3910_v14  ;;  %4693 = vst [vmem:[#allocation29_spill] sm:$0xff] %v4069_v56  ;;  %v1976_v1 = vadd.f32 %v3831_v24, %v1975_v26  ;;  %v1159_v26 = vld [vmem:[%s3616_s12 + $0x160] sm:$0xff] }
 0x309   : > { %v3169_v4 = vpop.eup %3168  ;;  %v1361_v29 = vmul.f32 1.442695, %v1238_v11  ;;  %v1776_v8 = vpack.c.bf16 %v1734_v40, %v1733_v52  ;;  %v2085_v21 = vpack.c.bf16 %v1976_v1, %v1974_v28  ;;  %v1524_v11 = vpop.permute.xlu2 %1523  ;;  %v1160_v28 = vld [vmem:[%s3616_s12 + $0x168] sm:$0xff] }
 0x30a   : > { %1551 = vrot.lane.b32.xlu1 %v3169_v4, %s3248_s18  ;;  %v1671_v1 = vmul.f32 %v1524_v11, %v1159_v26 }
 0x30b   : > { %3170 = vpow2.f32 %v1361_v29  ;;  %2934 = vmatmul.msk.bf16.gmra.mxu2 %vm1807_vm1, %v1776_v8  ;;  %2241 = vmatmul.bf16.gmra.mxu3 %v2085_v21 }
 0x30c   : > { %v1105_v41 = vpop.f32.mrf.mxu1 }
 0x30d   : > { %v4076_v37 = vadd.f32 %v3802_v5, %v1105_v41  ;;  %v1735_v41 = vadd.f32 %v1671_v1, %v3922_v25  ;;  %v3182_v1 = vld [vmem:[%s4642_s5] ss:$0 sm:$0xff] }
 0x30e   : > { %v1978_v62 = vpop.f32.mrf.mxu2  ;;  %v4079_v38 = vpop.f32.mrf.mxu3 }
 0x30f   : > { %v1239_v45 = vmul.f32 0.5, %v4076_v37  ;;  %4694 = vst [vmem:[#allocation30_spill] sm:$0xff] %v4079_v38 }
 0x311   : > { %v3171_v40 = vpop.eup %3170  ;;  %v1363_v52 = vmul.f32 1.442695, %v1239_v45  ;;  %v1979_v45 = vadd.f32 %v3831_v24, %v1978_v62 }
 0x312   : > { %1553 = vrot.lane.b32.xlu2 %v3171_v40, %s3248_s18 }
 0x313   : > { %3172 = vpow2.f32 %v1363_v52 }
 0x314   : > { %v1107_v4 = vpop.f32.mrf.mxu1  ;;  %v1526_v29 = vpop.permute.xlu0 %1525 }
 0x315   : > { %v4085_v8 = vadd.f32 %v3802_v5, %v1107_v4  ;;  %v1672_v21 = vmul.f32 %v1526_v29, %v1160_v28 }
 0x316   : > { %v1980_v56 = vpop.f32.mrf.mxu2  ;;  %v4090_v18 = vpop.f32.mrf.mxu3 }
 0x317   : > { %v1240_v14 = vmul.f32 0.5, %v4085_v8  ;;  %v1736_v38 = vadd.f32 %v1672_v21, %v3929_v53  ;;  %4695 = vst [vmem:[#allocation31_spill] sm:$0xff] %v4090_v18  ;;  %v1981_v26 = vadd.f32 %v3831_v24, %v1980_v56 }
 0x319   : > { %v3173_v11 = vpop.eup %3172  ;;  %v1365_v40 = vmul.f32 1.442695, %v1240_v14  ;;  %v1777_v5 = vpack.c.bf16 %v1736_v38, %v1735_v41  ;;  %v2086_v52 = vpack.c.bf16 %v1981_v26, %v1979_v45  ;;  %v1161_v14 = vld [vmem:[%s3616_s12 + $0x170] sm:$0xff]  ;;  %v1162_v41 = vld [vmem:[%s3616_s12 + $0x178] sm:$0xff]  ;;  %v1530_v45 = vpop.permute.xlu2 %1529 }
 0x31a   : > { %1555 = vrot.lane.b32.xlu0 %v3173_v11, %s3248_s18 }
 0x31b   : > { %3174 = vpow2.f32 %v1365_v40  ;;  %2935 = vmatmul.msk.bf16.gmra.mxu2 %vm1807_vm1, %v1777_v5  ;;  %2246 = vmatmul.bf16.gmra.mxu3 %v2086_v52  ;;  %v1674_v40 = vmul.f32 %v1530_v45, %v1162_v41 }
 0x31c   : > { %v1110_v28 = vpop.f32.mrf.mxu1  ;;  %v1528_v62 = vpop.permute.xlu1 %1527 }
 0x31d   : > { %v4099_v4 = vadd.f32 %v3182_v1, %v1110_v28  ;;  %v1673_v11 = vmul.f32 %v1528_v62, %v1161_v14 }
 0x31e   : > { %v1983_v29 = vpop.f32.mrf.mxu2  ;;  %v4103_v38 = vpop.f32.mrf.mxu3 }
 0x31f   : > { %4696 = vst [vmem:[#allocation32_spill] sm:$0xff] %v4099_v4  ;;  %v1241_v56 = vmul.f32 0.5, %v4099_v4  ;;  %v1737_v28 = vadd.f32 %v1673_v11, %v3941_v27 }
 0x320   : > { %4697 = vst [vmem:[#allocation33_spill] sm:$0xff] %v4103_v38  ;;  %v1738_v38 = vadd.f32 %v1674_v40, %v3948_v48 }
 0x321   : > { %v3175_v21 = vpop.eup %3174  ;;  %v1367_v26 = vmul.f32 1.442695, %v1241_v56  ;;  %v1984_v56 = vadd.f32 %v3831_v24, %v1983_v29  ;;  %v1163_v29 = vld [vmem:[%s3616_s12 + $0x180] sm:$0xff] }
 0x322   : > { %1557 = vrot.lane.b32.xlu1 %v3175_v21, %s3248_s18  ;;  %v1778_v41 = vpack.c.bf16 %v1738_v38, %v1737_v28 }
 0x323   : > { %3176 = vpow2.f32 %v1367_v26 }
 0x324   : > { %v1112_v5 = vpop.f32.mrf.mxu1 }
 0x325   : > { %v4107_v52 = vadd.f32 %v3182_v1, %v1112_v5 }
 0x326   : > { %v1985_v25 = vpop.f32.mrf.mxu2  ;;  %v4111_v4 = vpop.f32.mrf.mxu3 }
 0x327   : > { %v1242_v18 = vmul.f32 0.5, %v4107_v52  ;;  %v1986_v62 = vadd.f32 %v3831_v24, %v1985_v25 }
 0x329   : > { %v3177_v14 = vpop.eup %3176  ;;  %v1369_v21 = vmul.f32 1.442695, %v1242_v18  ;;  %v2087_v1 = vpack.c.bf16 %v1986_v62, %v1984_v56  ;;  %v1164_v18 = vld [vmem:[%s3616_s12 + $0x188] sm:$0xff] }
 0x32a   : > { %1559 = vrot.lane.b32.xlu2 %v3177_v14, %s3248_s18  ;;  %2406 = vrot.lane.b32.xlu1 %v3484_v3, %s3249_s21 }
 0x32b   : > { %3178 = vpow2.f32 %v1369_v21  ;;  %2936 = vmatmul.msk.bf16.gmra.mxu2 %vm1807_vm1, %v1778_v41  ;;  %2251 = vmatmul.bf16.gmra.mxu3 %v2087_v1 }
 0x32c   : > { %v1532_v24 = vpop.permute.xlu0 %1531 }
 0x32d   : > { %v1675_v38 = vmul.f32 %v1532_v24, %v1163_v29  ;;  %v1536_v29 = vpop.permute.xlu2 %1535 }
 0x32e   : > { %v1988_v45 = vpop.f32.mrf.mxu2  ;;  %v4120_v26 = vpop.f32.mrf.mxu3 }
 0x32f   : > { %v1739_v40 = vadd.f32 %v1675_v38, %v3958_v33 }
 0x331   : > { %v3179_v25 = vpop.eup %3178 }
 0x332   : > { %2408 = vrot.lane.b32.xlu2 %v3489_v10, %s3249_s21  ;;  %2412 = vrot.lane.b32.xlu1 %v3504_v30, %s3249_s21  ;;  %v4136_v10 = vld [vmem:[%s4644_s7] ss:$0 sm:$0xff] }
 0x333   : > { %1561 = vrot.lane.b32.xlu0 %v3179_v25, %s3248_s18  ;;  %v1989_v30 = vadd.f32 %v4136_v10, %v1988_v45  ;;  %v1165_v45 = vld [vmem:[%s3616_s12 + $0x190] sm:$0xff]  ;;  %s367_s18 = sand.u32 1, %s3238_s14  }
 0x334   : > { %v1534_v3 = vpop.permute.xlu1 %1533  ;;  %v1677_v24 = vmul.f32 %v1536_v29, %v1165_v45  ;;  %s2820_s27 = sshll.u32 %s367_s18, 9 }
 0x335   : > { %v1676_v11 = vmul.f32 %v1534_v3, %v1164_v18  ;;  %s4275_s25 = scalar_lea.vmem [#allocation2], %s2820_s27 }
 0x336   : > { %v1990_v28 = vpop.f32.mrf.mxu2  ;;  %v4131_v56 = vpop.f32.mrf.mxu3  ;;  %v1741_v25 = vadd.f32 %v1677_v24, %v3975_v39  ;;  %s2739_s29 = sshll.u32 %s4275_s25, 4  ;;  %s2740_s29 = int_to_ptr.vmem [resolvable:$true] %s2739_s29 }
 0x337   : > { %v1740_v5 = vadd.f32 %v1676_v11, %v3965_v59  ;;  %v1991_v62 = vadd.f32 %v4136_v10, %v1990_v28 }
 0x339   : > { %v1779_v14 = vpack.c.bf16 %v1740_v5, %v1739_v40  ;;  %v2088_v21 = vpack.c.bf16 %v1991_v62, %v1989_v30  ;;  %v1167_v5 = vld [vmem:[%s3616_s12 + $0x1a0] sm:$0xff]  ;;  %v1168_v62 = vld [vmem:[%s3616_s12 + $0x1a8] sm:$0xff] }
 0x33a   : > { %2414 = vrot.lane.b32.xlu2 %v3513_v43, %s3249_s21  ;;  %2418 = vrot.lane.b32.xlu1 %v3528_v0, %s3249_s21  ;;  %v1166_v43 = vld [vmem:[%s3616_s12 + $0x198] sm:$0xff] }
 0x33b   : > { %2410 = vrot.lane.b32.xlu0 %v3498_v22, %s3249_s21  ;;  %2937 = vmatmul.msk.bf16.gmra.mxu2 %vm1807_vm1, %v1779_v14 }
 0x33c   : > { %2256 = vmatmul.bf16.gmra.mxu3 %v2088_v21  ;;  %v1542_v14 = vpop.permute.xlu2 %1541 }
 0x33e   : > { %v1993_v41 = vpop.f32.mrf.mxu2  ;;  %v4147_v1 = vpop.f32.mrf.mxu3 }
 0x342   : > { %2420 = vrot.lane.b32.xlu2 %v3534_v9, %s3249_s21  ;;  %2424 = vrot.lane.b32.xlu1 %v3549_v32, %s3249_s21  ;;  %v1994_v9 = vadd.f32 %v4136_v10, %v1993_v41 }
 0x343   : > { %2416 = vrot.lane.b32.xlu0 %v3519_v51, %s3249_s21 }
 0x344   : > { %v1538_v22 = vpop.permute.xlu0 %1537 }
 0x345   : > { %v1678_v0 = vmul.f32 %v1538_v22, %v1166_v43  ;;  %v1169_v22 = vld [vmem:[%s3616_s12 + $0x1b0] sm:$0xff] }
 0x346   : > { %v1995_v38 = vpop.f32.mrf.mxu2  ;;  %v4159_v3 = vpop.f32.mrf.mxu3 }
 0x347   : > { %v1742_v18 = vadd.f32 %v1678_v0, %v3982_v61  ;;  %v1996_v32 = vadd.f32 %v4136_v10, %v1995_v38 }
 0x349   : > { %v1780_v11 = vpack.c.bf16 %v1742_v18, %v1741_v25  ;;  %v2089_v40 = vpack.c.bf16 %v1996_v32, %v1994_v9 }
 0x34a   : > { %2426 = vrot.lane.b32.xlu2 %v3558_v46, %s3249_s21  ;;  %2430 = vrot.lane.b32.xlu1 %v3573_v6, %s3249_s21 }
 0x34b   : > { %2422 = vrot.lane.b32.xlu0 %v3543_v23, %s3249_s21  ;;  %2938 = vmatmul.msk.bf16.gmra.mxu2 %vm1807_vm1, %v1780_v11  ;;  %v1680_v23 = vmul.f32 %v1542_v14, %v1168_v62 }
 0x34c   : > { %2261 = vmatmul.bf16.gmra.mxu3 %v2089_v40  ;;  %v1540_v51 = vpop.permute.xlu1 %1539 }
 0x34d   : > { %v1679_v21 = vmul.f32 %v1540_v51, %v1167_v5  ;;  %v1744_v45 = vadd.f32 %v1680_v23, %v4001_v7  ;;  %v1171_v5 = vld [vmem:[%s3616_s12 + $0x1c0] sm:$0xff] }
 0x34e   : > { %v1998_v28 = vpop.f32.mrf.mxu2  ;;  %v4171_v30 = vpop.f32.mrf.mxu3 }
 0x34f   : > { %v1743_v46 = vadd.f32 %v1679_v21, %v3992_v15  ;;  %v1999_v29 = vadd.f32 %v4136_v10, %v1998_v28 }
 0x351   : > { %v1781_v43 = vpack.c.bf16 %v1744_v45, %v1743_v46 }
 0x352   : > { %2432 = vrot.lane.b32.xlu2 %v3582_v17, %s3249_s21  ;;  %2436 = vrot.lane.b32.xlu1 %v3600_v44, %s3249_s21 }
 0x353   : > { %2428 = vrot.lane.b32.xlu0 %v3564_v55, %s3249_s21 }
 0x354   : > { %v1548_v28 = vpop.permute.xlu2 %1547 }
 0x355   : > { %v1683_v62 = vmul.f32 %v1548_v28, %v1171_v5 }
 0x356   : > { %v2000_v6 = vpop.f32.mrf.mxu2  ;;  %v4181_v41 = vpop.f32.mrf.mxu3 }
 0x357   : > { %v2001_v17 = vadd.f32 %v4136_v10, %v2000_v6  ;;  %v1747_v21 = vadd.f32 %v1683_v62, %v4034_v31  ;;  %v4704_v62 = vld [vmem:[#allocation13_spill] sm:$0xff] }
 0x359   : > { %v2090_v24 = vpack.c.bf16 %v2001_v17, %v1999_v29  ;;  %v4699_v17 = vld [vmem:[#allocation6_spill] sm:$0xff] }
 0x35a   : > { %2438 = vrot.lane.b32.xlu2 %v3609_v60, %s3249_s21  ;;  %2442 = vrot.lane.b32.xlu1 %v3636_v36, %s3249_s21  ;;  %v1170_v60 = vld [vmem:[%s3616_s12 + $0x1b8] sm:$0xff] }
 0x35b   : > { %2434 = vrot.lane.b32.xlu0 %v3594_v34, %s3249_s21  ;;  %2939 = vmatmul.msk.bf16.gmra.mxu2 %vm1807_vm1, %v1781_v43 }
 0x35c   : > { %2266 = vmatmul.bf16.gmra.mxu3 %v2090_v24  ;;  %v1544_v0 = vpop.permute.xlu0 %1543 }
 0x35d   : > { %v1681_v25 = vmul.f32 %v1544_v0, %v1169_v22 }
 0x35e   : > { %v2003_v55 = vpop.f32.mrf.mxu2  ;;  %v4193_v44 = vpop.f32.mrf.mxu3 }
 0x35f   : > { %v1745_v18 = vadd.f32 %v1681_v25, %v4013_v47 }
 0x362   : > { %2444 = vrot.lane.b32.xlu2 %v3644_v54, %s3249_s21  ;;  %2448 = vrot.lane.b32.xlu1 %v3664_v35, %s3249_s21  ;;  %v2004_v54 = vadd.f32 %v4136_v10, %v2003_v55  ;;  %v1173_v55 = vld [vmem:[%s3616_s12 + $0x1d0] sm:$0xff] }
 0x363   : > { %2440 = vrot.lane.b32.xlu0 %v3624_v13, %s3249_s21 }
 0x364   : > { %v1546_v34 = vpop.permute.xlu1 %1545 }
 0x365   : > { %v1682_v36 = vmul.f32 %v1546_v34, %v1170_v60  ;;  %v1174_v60 = vld [vmem:[%s3616_s12 + $0x1d8] sm:$0xff]  ;;  %v4702_v34 = vld [vmem:[#allocation7_spill] sm:$0xff] }
 0x366   : > { %v2005_v9 = vpop.f32.mrf.mxu2  ;;  %v4205_v32 = vpop.f32.mrf.mxu3 }
 0x367   : > { %v1746_v38 = vadd.f32 %v1682_v36, %v4022_v57  ;;  %v2006_v35 = vadd.f32 %v4136_v10, %v2005_v9 }
 0x369   : > { %v1782_v11 = vpack.c.bf16 %v1746_v38, %v1745_v18  ;;  %v2091_v40 = vpack.c.bf16 %v2006_v35, %v2004_v54 }
 0x36a   : > { %2450 = vrot.lane.b32.xlu2 %v3676_v58, %s3249_s21  ;;  %2454 = vrot.lane.b32.xlu1 %v3696_v42, %s3249_s21  ;;  %v1172_v58 = vld [vmem:[%s3616_s12 + $0x1c8] sm:$0xff]  ;;  %v4698_v42 = vld [vmem:[#allocation5_spill] sm:$0xff] }
 0x36b   : > { %2446 = vrot.lane.b32.xlu0 %v3656_v16, %s3249_s21  ;;  %2940 = vmatmul.msk.bf16.gmra.mxu2 %vm1807_vm1, %v1782_v11 }
 0x36c   : > { %2271 = vmatmul.bf16.gmra.mxu3 %v2091_v40  ;;  %v1554_v43 = vpop.permute.xlu2 %1553 }
 0x36d   : > { %v1686_v36 = vmul.f32 %v1554_v43, %v1174_v60  ;;  %v1176_v43 = vld [vmem:[%s3616_s12 + $0x1e8] sm:$0xff]  ;;  %v4710_v60 = vld [vmem:[#allocation12_spill] sm:$0xff] }
 0x36e   : > { %v2008_v13 = vpop.f32.mrf.mxu2  ;;  %v4216_v51 = vpop.f32.mrf.mxu3 }
 0x36f   : > { %v1750_v35 = vadd.f32 %v1686_v36, %v4064_v2 }
 0x372   : > { %2456 = vrot.lane.b32.xlu2 %v3704_v63, %s3249_s21  ;;  %2460 = vrot.lane.b32.xlu1 %v3724_v49, %s3249_s21  ;;  %v2009_v63 = vadd.f32 %v4136_v10, %v2008_v13  ;;  %v4263_v13 = vld [vmem:[%s4646_s9] ss:$0 sm:$0xff] }
 0x373   : > { %2452 = vrot.lane.b32.xlu0 %v4698_v42, %s3249_s21  ;;  %v4705_v42 = vld [vmem:[#allocation23_spill] sm:$0xff] }
 0x374   : > { %v1550_v16 = vpop.permute.xlu0 %1549 }
 0x375   : > { %v1684_v14 = vmul.f32 %v1550_v16, %v1172_v58  ;;  %v4703_v58 = vld [vmem:[#allocation11_spill] sm:$0xff]  ;;  %v2185_v16 = vadd.f32 %v4263_v13, %v4705_v42  ;;  %v4713_v42 = vld [vmem:[#allocation22_spill] sm:$0xff] }
 0x376   : > { %v2010_v46 = vpop.f32.mrf.mxu2  ;;  %v4228_v6 = vpop.f32.mrf.mxu3 }
 0x377   : > { %v1748_v23 = vadd.f32 %v1684_v14, %v4043_v50  ;;  %v2011_v49 = vadd.f32 %v4136_v10, %v2010_v46  ;;  %v4706_v14 = vld [vmem:[#allocation9_spill] sm:$0xff] }
 0x379   : > { %v1783_v45 = vpack.c.bf16 %v1748_v23, %v1747_v21  ;;  %v2092_v29 = vpack.c.bf16 %v2011_v49, %v2009_v63  ;;  %v1175_v49 = vld [vmem:[%s3616_s12 + $0x1e0] sm:$0xff] }
 0x37a   : > { %2462 = vrot.lane.b32.xlu2 %v3744_v19, %s3249_s21  ;;  %2466 = vrot.lane.b32.xlu1 %v3774_v12, %s3249_s21  ;;  %v4700_v19 = vld [vmem:[#allocation8_spill] sm:$0xff]  ;;  %v4701_v12 = vld [vmem:[#allocation10_spill] sm:$0xff] }
 0x37b   : > { %2458 = vrot.lane.b32.xlu0 %v4699_v17, %s3249_s21  ;;  %2941 = vmatmul.msk.bf16.gmra.mxu2 %vm1807_vm1, %v1783_v45  ;;  %v4708_v17 = vld [vmem:[#allocation16_spill] sm:$0xff] }
 0x37c   : > { %2276 = vmatmul.bf16.gmra.mxu3 %v2092_v29  ;;  %v1552_v24 = vpop.permute.xlu1 %1551  ;;  %v4707_v29 = vld [vmem:[#allocation14_spill] sm:$0xff] }
 0x37d   : > { %v1685_v25 = vmul.f32 %v1552_v24, %v1173_v55  ;;  %v4709_v24 = vld [vmem:[#allocation26_spill] sm:$0xff] }
 0x37e   : > { %v2013_v22 = vpop.f32.mrf.mxu2  ;;  %v4240_v0 = vpop.f32.mrf.mxu3  ;;  %v2193_v55 = vadd.f32 %v4263_v13, %v4709_v24  ;;  %v1177_v24 = vld [vmem:[%s3616_s12 + $0x1f0] sm:$0xff] }
 0x37f   : > { %v1749_v38 = vadd.f32 %v1685_v25, %v4055_v20  ;;  %v2014_v11 = vadd.f32 %v4136_v10, %v2013_v22 }
 0x381   : > { %v1784_v5 = vpack.c.bf16 %v1750_v35, %v1749_v38 }
 0x382   : > { %2468 = vrot.lane.b32.xlu2 %v4700_v19, %s3249_s21  ;;  %2472 = vrot.lane.b32.xlu1 %v4701_v12, %s3249_s21 }
 0x383   : > { %2464 = vrot.lane.b32.xlu0 %v4702_v34, %s3249_s21 }
 0x384   : > { %v4249_v18 = vpop.permute.xlu2 %1559 }
 0x386   : > { %v2015_v9 = vpop.f32.mrf.mxu2  ;;  %v4253_v54 = vpop.f32.mrf.mxu3 }
 0x387   : > { %v2016_v40 = vadd.f32 %v4136_v10, %v2015_v9 }
 0x389   : > { %v2093_v28 = vpack.c.bf16 %v2016_v40, %v2014_v11 }
 0x38a   : > { %2474 = vrot.lane.b32.xlu2 %v4703_v58, %s3249_s21  ;;  %2478 = vrot.lane.b32.xlu1 %v4704_v62, %s3249_s21  ;;  %v4711_v58 = vld [vmem:[#allocation17_spill] sm:$0xff]  ;;  %v4712_v62 = vld [vmem:[#allocation19_spill] sm:$0xff] }
 0x38b   : > { %2470 = vrot.lane.b32.xlu0 %v4706_v14, %s3249_s21  ;;  %2942 = vmatmul.msk.bf16.gmra.mxu2 %vm1807_vm1, %v1784_v5  ;;  %v4714_v14 = vld [vmem:[#allocation29_spill] sm:$0xff] }
 0x38c   : > { %2281 = vmatmul.bf16.gmra.mxu3 %v2093_v28  ;;  %v2409_v21 = vpop.permute.xlu2 %2408  ;;  %v1556_v45 = vpop.permute.xlu0 %1555 }
 0x38d   : > { %v2599_v23 = vsel %vm516_vm0, %v2185_v16, %v2409_v21  ;;  %v1687_v22 = vmul.f32 %v1556_v45, %v1175_v49  ;;  %v2183_v16 = vadd.f32 %v4263_v13, %v4713_v42  ;;  %v2200_v21 = vadd.f32 %v4263_v13, %v4714_v14 }
 0x38e   : > { %2663 = vst [vmem:[%s4275_s25 + $0x8] sm:$0xff] %v2599_v23  ;;  %v2018_v46 = vpop.f32.mrf.mxu2  ;;  %v4278_v63 = vpop.f32.mrf.mxu3  ;;  %v4715_v23 = vld [vmem:[#allocation15_spill] sm:$0xff] }
 0x38f   : > { %v1751_v36 = vadd.f32 %v1687_v22, %v4076_v37  ;;  %v2019_v11 = vadd.f32 %v4136_v10, %v2018_v46  ;;  %v4717_v22 = vld [vmem:[#allocation25_spill] sm:$0xff] }
 0x392   : > { %2480 = vrot.lane.b32.xlu2 %v4707_v29, %s3249_s21  ;;  %2484 = vrot.lane.b32.xlu1 %v4708_v17, %s3249_s21 }
 0x393   : > { %2476 = vrot.lane.b32.xlu0 %v4710_v60, %s3249_s21  ;;  %v2190_v60 = vadd.f32 %v4263_v13, %v4717_v22 }
 0x394   : > { %v1558_v25 = vpop.permute.xlu1 %1557  ;;  %v2415_v19 = vpop.permute.xlu2 %2414 }
 0x395   : > { %v1688_v12 = vmul.f32 %v1558_v25, %v1176_v43  ;;  %v2602_v34 = vsel %vm516_vm0, %v2193_v55, %v2415_v19  ;;  %v4716_v55 = vld [vmem:[#allocation20_spill] sm:$0xff]  ;;  %v4718_v25 = vld [vmem:[#allocation33_spill] sm:$0xff] }
 0x396   : > { %2666 = vst [vmem:[%s4275_s25 + $0x20] sm:$0xff] %v2602_v34  ;;  %v2020_v9 = vpop.f32.mrf.mxu2  ;;  %v4294_v35 = vpop.f32.mrf.mxu3  ;;  %v2208_v19 = vadd.f32 %v4263_v13, %v4718_v25  ;;  %v1178_v34 = vld [vmem:[%s3616_s12 + $0x1f8] sm:$0xff]  ;;  %s3004_s12 = sshll.u32 %s3328_s17, 9  ;;  %s2727_s17 = scalar_lea.sflag [#allocation3], %s367_s18 }
 0x397   : > { %v1752_v38 = vadd.f32 %v1688_v12, %v4085_v8  ;;  %v2021_v40 = vadd.f32 %v4136_v10, %v2020_v9  ;;  %v4719_v12 = vld [vmem:[#allocation18_spill] sm:$0xff] }
 0x399   : > { %v1785_v5 = vpack.c.bf16 %v1752_v38, %v1751_v36  ;;  %v2094_v28 = vpack.c.bf16 %v2021_v40, %v2019_v11  ;;  %v1689_v36 = vmul.f32 %v4249_v18, %v1177_v24 }
 0x39a   : > { %2486 = vrot.lane.b32.xlu2 %v4711_v58, %s3249_s21  ;;  %2490 = vrot.lane.b32.xlu1 %v4712_v62, %s3249_s21  ;;  %v4720_v62 = vld [vmem:[#allocation32_spill] sm:$0xff] }
 0x39b   : > { %2482 = vrot.lane.b32.xlu0 %v4715_v23, %s3249_s21  ;;  %2943 = vmatmul.msk.bf16.gmra.mxu2 %vm1807_vm1, %v1785_v5  ;;  %v1753_v42 = vadd.f32 %v1689_v36, %v4720_v62  ;;  %v2223_v36 = vadd.f32 %v4263_v13, %v4171_v30 }
 0x39c   : > { %2286 = vmatmul.bf16.gmra.mxu3 %v2094_v28  ;;  %v2421_v46 = vpop.permute.xlu2 %2420  ;;  %v2407_v49 = vpop.permute.xlu1 %2406 }
 0x39d   : > { %v2605_v45 = vsel %vm516_vm0, %v2200_v21, %v2421_v46  ;;  %v2598_v29 = vsel %vm516_vm0, %v2183_v16, %v2407_v49  ;;  %v4721_v46 = vld [vmem:[#allocation28_spill] sm:$0xff] }
 0x39e   : > { %2669 = vst [vmem:[%s4275_s25 + $0x38] sm:$0xff] %v2605_v45  ;;  %v2023_v17 = vpop.f32.mrf.mxu2  ;;  %v4313_v43 = vpop.f32.mrf.mxu3  ;;  %v2198_v49 = vadd.f32 %v4263_v13, %v4721_v46  ;;  %v2215_v45 = vadd.f32 %v4263_v13, %v4131_v56 }
 0x39f   : > { %2662 = vst [vmem:[%s4275_s25] sm:$0xff] %v2598_v29  ;;  %v2024_v16 = vadd.f32 %v4136_v10, %v2023_v17  ;;  %v4722_v29 = vld [vmem:[#allocation21_spill] sm:$0xff]  ;;  %v4723_v17 = vld [vmem:[#allocation24_spill] sm:$0xff] }
 0x3a0   : > { %v2188_v24 = vadd.f32 %v4263_v13, %v4723_v17  ;;  %v2238_v17 = vadd.f32 %v4263_v13, %v4240_v0 }
 0x3a2   : > { %2492 = vrot.lane.b32.xlu2 %v4716_v55, %s3249_s21  ;;  %2496 = vrot.lane.b32.xlu1 %v3929_v53, %s3249_s21 }
 0x3a3   : > { %2488 = vrot.lane.b32.xlu0 %v4719_v12, %s3249_s21  ;;  %v4724_v12 = vld [vmem:[#allocation31_spill] sm:$0xff] }
 0x3a4   : > { %v2427_v38 = vpop.permute.xlu2 %2426  ;;  %v2413_v9 = vpop.permute.xlu1 %2412 }
 0x3a5   : > { %v2608_v11 = vsel %vm516_vm0, %v2208_v19, %v2427_v38  ;;  %v2601_v40 = vsel %vm516_vm0, %v2190_v60, %v2413_v9  ;;  %v1562_v5 = vpop.permute.xlu0 %1561  ;;  %v4725_v38 = vld [vmem:[#allocation27_spill] sm:$0xff] }
 0x3a6   : > { %2672 = vst [vmem:[%s4275_s25 + $0x50] sm:$0xff] %v2608_v11  ;;  %v1690_v53 = vmul.f32 %v1562_v5, %v1178_v34  ;;  %v2025_v28 = vpop.f32.mrf.mxu2  ;;  %v4332_v58 = vpop.f32.mrf.mxu3  ;;  %v2205_v34 = vadd.f32 %v4263_v13, %v4724_v12  ;;  %v2195_v9 = vadd.f32 %v4263_v13, %v4725_v38  ;;  %v2218_v12 = vadd.f32 %v4263_v13, %v4147_v1 }
 0x3a7   : > { %2665 = vst [vmem:[%s4275_s25 + $0x18] sm:$0xff] %v2601_v40  ;;  %v2026_v18 = vadd.f32 %v4136_v10, %v2025_v28 }
 0x3a8   : > { %v1754_v14 = vadd.f32 %v1690_v53, %v4107_v52 }
 0x3a9   : > { %v2095_v23 = vpack.c.bf16 %v2026_v18, %v2024_v16  ;;  %v2230_v18 = vadd.f32 %v4263_v13, %v4205_v32 }
 0x3aa   : > { %v1786_v21 = vpack.c.bf16 %v1754_v14, %v1753_v42  ;;  %2498 = vrot.lane.b32.xlu2 %v3941_v27, %s3249_s21  ;;  %2502 = vrot.lane.b32.xlu1 %v3958_v33, %s3249_s21  ;;  %v2213_v14 = vadd.f32 %v4263_v13, %v4120_v26 }
 0x3ab   : > { %2494 = vrot.lane.b32.xlu0 %v4722_v29, %s3249_s21 }
 0x3ac   : > { %2944 = vmatmul.msk.bf16.gmra.mxu2 %vm1807_vm1, %v1786_v21  ;;  %2291 = vmatmul.bf16.gmra.mxu3 %v2095_v23  ;;  %v2433_v27 = vpop.permute.xlu2 %2432  ;;  %v2419_v55 = vpop.permute.xlu1 %2418  ;;  %v4726_v21 = vld [vmem:[#allocation30_spill] sm:$0xff] }
 0x3ad   : > { %v2611_v33 = vsel %vm516_vm0, %v2215_v45, %v2433_v27  ;;  %v2604_v22 = vsel %vm516_vm0, %v2198_v49, %v2419_v55  ;;  %v2411_v60 = vpop.permute.xlu0 %2410  ;;  %v2203_v23 = vadd.f32 %v4263_v13, %v4726_v21 }
 0x3ae   : > { %2675 = vst [vmem:[%s4275_s25 + $0x68] sm:$0xff] %v2611_v33  ;;  %v2600_v25 = vsel %vm516_vm0, %v2188_v24, %v2411_v60  ;;  %v2028_v56 = vpop.f32.mrf.mxu2  ;;  %v4356_v19 = vpop.f32.mrf.mxu3  ;;  %v2210_v24 = vadd.f32 %v4263_v13, %v4111_v4 }
 0x3af   : > { %2668 = vst [vmem:[%s4275_s25 + $0x30] sm:$0xff] %v2604_v22  ;;  %v2029_v30 = vadd.f32 %v4136_v10, %v2028_v56  ;;  %v2245_v56 = vadd.f32 %v4263_v13, %v4294_v35  ;;  %v2253_v1 = vadd.f32 %v4263_v13, %v4356_v19 }
 0x3b0   : > { %2664 = vst [vmem:[%s4275_s25 + $0x10] sm:$0xff] %v2600_v25  ;;  %v2228_v25 = vadd.f32 %v4263_v13, %v4193_v44 }
 0x3b2   : > { %2504 = vrot.lane.b32.xlu2 %v3965_v59, %s3249_s21  ;;  %2508 = vrot.lane.b32.xlu1 %v3982_v61, %s3249_s21 }
 0x3b3   : > { %2500 = vrot.lane.b32.xlu0 %v3948_v48, %s3249_s21 }
 0x3b4   : > { %v2439_v11 = vpop.permute.xlu2 %2438  ;;  %v2425_v40 = vpop.permute.xlu1 %2424 }
 0x3b5   : > { %v2614_v59 = vsel %vm516_vm0, %v2223_v36, %v2439_v11  ;;  %v2607_v5 = vsel %vm516_vm0, %v2205_v34, %v2425_v40  ;;  %v2417_v61 = vpop.permute.xlu0 %2416  ;;  %v2225_v11 = vadd.f32 %v4263_v13, %v4181_v41 }
 0x3b6   : > { %2678 = vst [vmem:[%s4275_s25 + $0x80] sm:$0xff] %v2614_v59  ;;  %v2603_v53 = vsel %vm516_vm0, %v2195_v9, %v2417_v61  ;;  %v2030_v28 = vpop.f32.mrf.mxu2  ;;  %v4376_v42 = vpop.f32.mrf.mxu3 }
 0x3b7   : > { %2671 = vst [vmem:[%s4275_s25 + $0x48] sm:$0xff] %v2607_v5  ;;  %v2031_v48 = vadd.f32 %v4136_v10, %v2030_v28  ;;  %v2243_v28 = vadd.f32 %v4263_v13, %v4278_v63 }
 0x3b8   : > { %2667 = vst [vmem:[%s4275_s25 + $0x28] sm:$0xff] %v2603_v53 }
 0x3b9   : > { %v2096_v16 = vpack.c.bf16 %v2031_v48, %v2029_v30  ;;  %v2233_v48 = vadd.f32 %v4263_v13, %v4216_v51  ;;  %v2250_v51 = vadd.f32 %v4263_v13, %v4332_v58 }
 0x3ba   : > { %2510 = vrot.lane.b32.xlu2 %v3992_v15, %s3249_s21  ;;  %2514 = vrot.lane.b32.xlu1 %v4013_v47, %s3249_s21 }
 0x3bb   : > { %2506 = vrot.lane.b32.xlu0 %v3975_v39, %s3249_s21  ;;  %v2220_v39 = vadd.f32 %v4263_v13, %v4159_v3 }
 0x3bc   : > { %2296 = vmatmul.bf16.gmra.mxu3 %v2096_v16  ;;  %v2445_v46 = vpop.permute.xlu2 %2444  ;;  %v2431_v49 = vpop.permute.xlu1 %2430 }
 0x3bd   : > { %v2617_v15 = vsel %vm516_vm0, %v2230_v18, %v2445_v46  ;;  %v2610_v47 = vsel %vm516_vm0, %v2213_v14, %v2431_v49  ;;  %v2423_v45 = vpop.permute.xlu0 %2422 }
 0x3be   : > { %2681 = vst [vmem:[%s4275_s25 + $0x98] sm:$0xff] %v2617_v15  ;;  %v2606_v26 = vsel %vm516_vm0, %v2203_v23, %v2423_v45  ;;  %v2033_v32 = vpop.f32.mrf.mxu2  ;;  %v2240_v15 = vadd.f32 %v4263_v13, %v4253_v54 }
 0x3bf   : > { %2674 = vst [vmem:[%s4275_s25 + $0x60] sm:$0xff] %v2610_v47  ;;  %v4398_v29 = vpop.f32.mrf.mxu3  ;;  %v2034_v0 = vadd.f32 %v4136_v10, %v2033_v32 }
 0x3c0   : > { %2670 = vst [vmem:[%s4275_s25 + $0x40] sm:$0xff] %v2606_v26 }
 0x3c2   : > { %2516 = vrot.lane.b32.xlu2 %v4022_v57, %s3249_s21  ;;  %2520 = vrot.lane.b32.xlu1 %v4043_v50, %s3249_s21 }
 0x3c3   : > { %2512 = vrot.lane.b32.xlu0 %v4001_v7, %s3249_s21 }
 0x3c4   : > { %v2451_v27 = vpop.permute.xlu2 %2450  ;;  %v2437_v55 = vpop.permute.xlu1 %2436 }
 0x3c5   : > { %v2620_v57 = vsel %vm516_vm0, %v2238_v17, %v2451_v27  ;;  %v2613_v33 = vsel %vm516_vm0, %v2220_v39, %v2437_v55  ;;  %v2429_v50 = vpop.permute.xlu0 %2428 }
 0x3c6   : > { %2684 = vst [vmem:[%s4275_s25 + $0xb0] sm:$0xff] %v2620_v57  ;;  %v2609_v22 = vsel %vm516_vm0, %v2210_v24, %v2429_v50  ;;  %v2035_v3 = vpop.f32.mrf.mxu2  ;;  %v2258_v57 = vadd.f32 %v4263_v13, %v4398_v29  ;;  %v2255_v29 = vadd.f32 %v4263_v13, %v4376_v42 }
 0x3c7   : > { %2677 = vst [vmem:[%s4275_s25 + $0x78] sm:$0xff] %v2613_v33  ;;  %v2259_v60 = vpop.f32.mrf.mxu3  ;;  %v2036_v7 = vadd.f32 %v4136_v10, %v2035_v3  ;;  %v2248_v33 = vadd.f32 %v4263_v13, %v4313_v43 }
 0x3c8   : > { %2673 = vst [vmem:[%s4275_s25 + $0x58] sm:$0xff] %v2609_v22  ;;  %v2260_v30 = vadd.f32 %v4263_v13, %v2259_v60 }
 0x3c9   : > { %v2097_v4 = vpack.c.bf16 %v2036_v7, %v2034_v0 }
 0x3ca   : > { %2522 = vrot.lane.b32.xlu2 %v4055_v20, %s3249_s21  ;;  %2526 = vrot.lane.b32.xlu1 %v4076_v37, %s3249_s21 }
 0x3cb   : > { %2518 = vrot.lane.b32.xlu0 %v4034_v31, %s3249_s21  ;;  %v2235_v31 = vadd.f32 %v4263_v13, %v4228_v6 }
 0x3cc   : > { %2301 = vmatmul.bf16.gmra.mxu3 %v2097_v4  ;;  %v2457_v34 = vpop.permute.xlu2 %2456  ;;  %v2443_v36 = vpop.permute.xlu1 %2442 }
 0x3cd   : > { %v2623_v20 = vsel %vm516_vm0, %v2245_v56, %v2457_v34  ;;  %v2616_v37 = vsel %vm516_vm0, %v2228_v25, %v2443_v36  ;;  %v2435_v38 = vpop.permute.xlu0 %2434 }
 0x3ce   : > { %2687 = vst [vmem:[%s4275_s25 + $0xc8] sm:$0xff] %v2623_v20  ;;  %v2612_v44 = vsel %vm516_vm0, %v2218_v12, %v2435_v38  ;;  %v2038_v35 = vpop.f32.mrf.mxu2 }
 0x3cf   : > { %2680 = vst [vmem:[%s4275_s25 + $0x90] sm:$0xff] %v2616_v37  ;;  %v4438_v9 = vpop.f32.mrf.mxu3  ;;  %v2039_v53 = vadd.f32 %v4136_v10, %v2038_v35 }
 0x3d0   : > { %2676 = vst [vmem:[%s4275_s25 + $0x70] sm:$0xff] %v2612_v44 }
 0x3d2   : > { %2528 = vrot.lane.b32.xlu2 %v4085_v8, %s3249_s21  ;;  %2532 = vrot.lane.b32.xlu1 %v4107_v52, %s3249_s21 }
 0x3d3   : > { %2524 = vrot.lane.b32.xlu0 %v4064_v2, %s3249_s21 }
 0x3d4   : > { %v2463_v40 = vpop.permute.xlu2 %2462  ;;  %v2449_v59 = vpop.permute.xlu1 %2448 }
 0x3d5   : > { %v2626_v8 = vsel %vm516_vm0, %v2253_v1, %v2463_v40  ;;  %v2619_v5 = vsel %vm516_vm0, %v2235_v31, %v2449_v59  ;;  %v2441_v52 = vpop.permute.xlu0 %2440  ;;  %v2263_v1 = vadd.f32 %v4263_v13, %v4438_v9 }
 0x3d6   : > { %2690 = vst [vmem:[%s4275_s25 + $0xe0] sm:$0xff] %v2626_v8  ;;  %v2615_v61 = vsel %vm516_vm0, %v2225_v11, %v2441_v52  ;;  %v2040_v6 = vpop.f32.mrf.mxu2 }
 0x3d7   : > { %2683 = vst [vmem:[%s4275_s25 + $0xa8] sm:$0xff] %v2619_v5  ;;  %v2264_v19 = vpop.f32.mrf.mxu3  ;;  %v2041_v2 = vadd.f32 %v4136_v10, %v2040_v6 }
 0x3d8   : > { %2679 = vst [vmem:[%s4275_s25 + $0x88] sm:$0xff] %v2615_v61  ;;  %v2265_v4 = vadd.f32 %v4263_v13, %v2264_v19 }
 0x3d9   : > { %v2098_v41 = vpack.c.bf16 %v2041_v2, %v2039_v53 }
 0x3db   : > { %2530 = vrot.lane.b32.xlu0 %v4720_v62, %s3249_s21  ;;  %s2738_s21 = scalar_lea.hbm %s4647_s10, %s3004_s12 }
 0x3dc   : > { %2306 = vmatmul.bf16.gmra.mxu3 %v2098_v41  ;;  %v2469_v16 = vpop.permute.xlu2 %2468  ;;  %v2455_v14 = vpop.permute.xlu1 %2454  ;;  %s2741_s11 = sshll.u32 %s2738_s21, 4  ;;  %s2742_s11 = int_to_ptr.hbm [resolvable:$true] %s2741_s11 }
 0x3dd   : > { %v2629_v18 = vsel %vm516_vm0, %v2260_v30, %v2469_v16  ;;  %v2622_v21 = vsel %vm516_vm0, %v2243_v28, %v2455_v14  ;;  %v2447_v23 = vpop.permute.xlu0 %2446  ;;  %s3198_s27 = sshra.s32 %s2742_s11, 4  ;;  %s3199_s27 = int_to_ptr.hbm [resolvable:$true] %s3198_s27 }
 0x3de   : > { %2693 = vst [vmem:[%s4275_s25 + $0xf8] sm:$0xff] %v2629_v18  ;;  %v2618_v63 = vsel %vm516_vm0, %v2233_v48, %v2447_v23  ;;  %v2043_v46 = vpop.f32.mrf.mxu2  ;;  %s3200_s30 = scalar_lea.hbm %s3199_s27, 512  ;;  %p3205_p0 = scmp.lt.s32.totalorder %s3199_s27, %s4647_s10 }
 0x3df   : > { %2686 = vst [vmem:[%s4275_s25 + $0xc0] sm:$0xff] %v2622_v21  ;;  %v2267_v49 = vpop.f32.mrf.mxu3  ;;  %v2044_v27 = vadd.f32 %v4136_v10, %v2043_v46  ;;  %p3201_p11 = scmp.ne.s32.totalorder %s3199_s27, %s3200_s30  ;;  %p3206_p1 = scmp.lt.s32.totalorder %s3204_s26, %s3200_s30 }
 0x3e0   : > { %2682 = vst [vmem:[%s4275_s25 + $0xa0] sm:$0xff] %v2618_v63  ;;  %v2268_v62 = vadd.f32 %v4263_v13, %v2267_v49 }
 0x3e1   : > { %p3202_p12 = pnand %p3201_p11, %p3345_p5  ;;  %p3207_p2 = por %p3206_p1, %p3205_p0 }
 0x3e3   : > { %p3203_p13 = pneg %p3202_p12 }
 0x3e4   : > { %v2475_v47 = vpop.permute.xlu2 %2474  ;;  %v2461_v45 = vpop.permute.xlu1 %2460 }
 0x3e5   : > { %v2632_v26 = vsel %vm516_vm0, %v2268_v62, %v2475_v47  ;;  %v2625_v32 = vsel %vm516_vm0, %v2250_v51, %v2461_v45  ;;  %v2453_v39 = vpop.permute.xlu0 %2452  ;;  %p3208_p3 = pnand %p3207_p2, %p3203_p13 }
 0x3e6   : > { %2696 = vst [vmem:[%s4275_s25 + $0x110] sm:$0xff] %v2632_v26  ;;  %v2621_v17 = vsel %vm516_vm0, %v2240_v15, %v2453_v39  ;;  %v2045_v24 = vpop.f32.mrf.mxu2 }
 0x3e7   : > { %2689 = vst [vmem:[%s4275_s25 + $0xd8] sm:$0xff] %v2625_v32  ;;  %v2269_v58 = vpop.f32.mrf.mxu3  ;;  %v2046_v54 = vadd.f32 %v4136_v10, %v2045_v24 }
 0x3e8   : > { %2685 = vst [vmem:[%s4275_s25 + $0xb8] sm:$0xff] %v2621_v17  ;;  %v2270_v61 = vadd.f32 %v4263_v13, %v2269_v58 }
 0x3e9   : > { %v2099_v55 = vpack.c.bf16 %v2046_v54, %v2044_v27 }
 0x3ec   : > { %2311 = vmatmul.bf16.gmra.mxu3 %v2099_v55  ;;  %v2467_v50 = vpop.permute.xlu1 %2466  ;;  %v2481_v42 = vpop.permute.xlu2 %2480 }
 0x3ed   : > { %v2628_v22 = vsel %vm516_vm0, %v2258_v57, %v2467_v50  ;;  %v2459_v3 = vpop.permute.xlu0 %2458 }
 0x3ee   : > { %2692 = vst [vmem:[%s4275_s25 + $0xf0] sm:$0xff] %v2628_v22  ;;  %v2624_v60 = vsel %vm516_vm0, %v2248_v33, %v2459_v3  ;;  %v2048_v0 = vpop.f32.mrf.mxu2 }
 0x3ef   : > { %2688 = vst [vmem:[%s4275_s25 + $0xd0] sm:$0xff] %v2624_v60  ;;  %v2272_v7 = vpop.f32.mrf.mxu3  ;;  %v2049_v20 = vadd.f32 %v4136_v10, %v2048_v0 }
 0x3f0   : > { %v2273_v31 = vadd.f32 %v4263_v13, %v2272_v7 }
 0x3f4   : > { %v2473_v25 = vpop.permute.xlu1 %2472  ;;  %v2487_v49 = vpop.permute.xlu2 %2486 }
 0x3f5   : > { %v2631_v43 = vsel %vm516_vm0, %v2265_v4, %v2473_v25  ;;  %v2465_v56 = vpop.permute.xlu0 %2464 }
 0x3f6   : > { %2695 = vst [vmem:[%s4275_s25 + $0x108] sm:$0xff] %v2631_v43  ;;  %v2627_v12 = vsel %vm516_vm0, %v2255_v29, %v2465_v56  ;;  %v2050_v34 = vpop.f32.mrf.mxu2 }
 0x3f7   : > { %2691 = vst [vmem:[%s4275_s25 + $0xe8] sm:$0xff] %v2627_v12  ;;  %v2274_v36 = vpop.f32.mrf.mxu3  ;;  %v2051_v37 = vadd.f32 %v4136_v10, %v2050_v34 }
 0x3f8   : > { %v2275_v38 = vadd.f32 %v4263_v13, %v2274_v36 }
 0x3f9   : > { %v2100_v44 = vpack.c.bf16 %v2051_v37, %v2049_v20 }
 0x3fa   : > { %v2635_v35 = vsel %vm516_vm0, %v2275_v38, %v2481_v42 }
 0x3fb   : > { %2699 = vst [vmem:[%s4275_s25 + $0x128] sm:$0xff] %v2635_v35 }
 0x3fc   : > { %2316 = vmatmul.bf16.gmra.mxu3 %v2100_v44  ;;  %v2479_v11 = vpop.permute.xlu1 %2478  ;;  %v2493_v60 = vpop.permute.xlu2 %2492 }
 0x3fd   : > { %v2634_v40 = vsel %vm516_vm0, %v2273_v31, %v2479_v11  ;;  %v2471_v59 = vpop.permute.xlu0 %2470 }
 0x3fe   : > { %2698 = vst [vmem:[%s4275_s25 + $0x120] sm:$0xff] %v2634_v40  ;;  %v2630_v8 = vsel %vm516_vm0, %v2263_v1, %v2471_v59  ;;  %v2053_v5 = vpop.f32.mrf.mxu2 }
 0x3ff   : > { %2694 = vst [vmem:[%s4275_s25 + $0x100] sm:$0xff] %v2630_v8  ;;  %v2277_v52 = vpop.f32.mrf.mxu3  ;;  %v2054_v2 = vadd.f32 %v4136_v10, %v2053_v5 }
 0x400   : > { %v2278_v14 = vadd.f32 %v4263_v13, %v2277_v52 }
 0x404   : > { %v2485_v30 = vpop.permute.xlu1 %2484  ;;  %v2499_v1 = vpop.permute.xlu2 %2498 }
 0x405   : > { %v2477_v6 = vpop.permute.xlu0 %2476 }
 0x406   : > { %v2633_v19 = vsel %vm516_vm0, %v2270_v61, %v2477_v6  ;;  %v2055_v9 = vpop.f32.mrf.mxu2 }
 0x407   : > { %2697 = vst [vmem:[%s4275_s25 + $0x118] sm:$0xff] %v2633_v19  ;;  %v2279_v53 = vpop.f32.mrf.mxu3  ;;  %v2056_v41 = vadd.f32 %v4136_v10, %v2055_v9 }
 0x408   : > { %v2280_v28 = vadd.f32 %v4263_v13, %v2279_v53 }
 0x409   : > { %v2101_v48 = vpack.c.bf16 %v2056_v41, %v2054_v2 }
 0x40a   : > { %v2637_v16 = vsel %vm516_vm0, %v2280_v28, %v2485_v30 }
 0x40b   : > { %2701 = vst [vmem:[%s4275_s25 + $0x138] sm:$0xff] %v2637_v16 }
 0x40c   : > { %2321 = vmatmul.bf16.gmra.mxu3 %v2101_v48  ;;  %v2491_v54 = vpop.permute.xlu1 %2490  ;;  %v2505_v53 = vpop.permute.xlu2 %2504 }
 0x40d   : > { %v2483_v18 = vpop.permute.xlu0 %2482 }
 0x40e   : > { %v2636_v21 = vsel %vm516_vm0, %v2278_v14, %v2483_v18  ;;  %v2058_v23 = vpop.f32.mrf.mxu2 }
 0x40f   : > { %2700 = vst [vmem:[%s4275_s25 + $0x130] sm:$0xff] %v2636_v21  ;;  %v2282_v63 = vpop.f32.mrf.mxu3  ;;  %v2059_v47 = vadd.f32 %v4136_v10, %v2058_v23 }
 0x410   : > { %v2283_v46 = vadd.f32 %v4263_v13, %v2282_v63 }
 0x412   : > { %v2638_v51 = vsel %vm516_vm0, %v2283_v46, %v2487_v49 }
 0x413   : > { %2702 = vst [vmem:[%s4275_s25 + $0x140] sm:$0xff] %v2638_v51 }
 0x414   : > { %v2497_v38 = vpop.permute.xlu1 %2496  ;;  %v2511_v46 = vpop.permute.xlu2 %2510 }
 0x415   : > { %v2489_v32 = vpop.permute.xlu0 %2488 }
 0x416   : > { %v2060_v62 = vpop.f32.mrf.mxu2 }
 0x417   : > { %v2284_v15 = vpop.f32.mrf.mxu3  ;;  %v2061_v45 = vadd.f32 %v4136_v10, %v2060_v62 }
 0x418   : > { %v2285_v26 = vadd.f32 %v4263_v13, %v2284_v15 }
 0x419   : > { %v2102_v39 = vpack.c.bf16 %v2061_v45, %v2059_v47 }
 0x41a   : > { %v2639_v17 = vsel %vm516_vm0, %v2285_v26, %v2489_v32 }
 0x41b   : > { %2703 = vst [vmem:[%s4275_s25 + $0x148] sm:$0xff] %v2639_v17 }
 0x41c   : > { %2326 = vmatmul.bf16.gmra.mxu3 %v2102_v39  ;;  %v2503_v61 = vpop.permute.xlu1 %2502 }
 0x41d   : > { %v2495_v43 = vpop.permute.xlu0 %2494 }
 0x41e   : > { %v2063_v24 = vpop.f32.mrf.mxu2 }
 0x41f   : > { %v2287_v58 = vpop.f32.mrf.mxu3  ;;  %v2064_v50 = vadd.f32 %v4136_v10, %v2063_v24 }
 0x420   : > { %v2288_v27 = vadd.f32 %v4263_v13, %v2287_v58  ;;  %v2517_v58 = vpop.permute.xlu2 %2516 }
 0x422   : > { %v2640_v55 = vsel %vm516_vm0, %v2288_v27, %v2491_v54 }
 0x423   : > { %2704 = vst [vmem:[%s4275_s25 + $0x150] sm:$0xff] %v2640_v55 }
 0x424   : > { %v2509_v18 = vpop.permute.xlu1 %2508 }
 0x425   : > { %v2501_v59 = vpop.permute.xlu0 %2500 }
 0x426   : > { %v2065_v57 = vpop.f32.mrf.mxu2 }
 0x427   : > { %v2289_v33 = vpop.f32.mrf.mxu3  ;;  %v2066_v22 = vadd.f32 %v4136_v10, %v2065_v57 }
 0x428   : > { %v2290_v3 = vadd.f32 %v4263_v13, %v2289_v33 }
 0x429   : > { %v2103_v0 = vpack.c.bf16 %v2066_v22, %v2064_v50 }
 0x42a   : > { %v2641_v7 = vsel %vm516_vm0, %v2290_v3, %v2493_v60 }
 0x42b   : > { %2705 = vst [vmem:[%s4275_s25 + $0x158] sm:$0xff] %v2641_v7 }
 0x42c   : > { %2331 = vmatmul.bf16.gmra.mxu3 %v2103_v0  ;;  %v2515_v32 = vpop.permute.xlu1 %2514 }
 0x42d   : > { %v2507_v30 = vpop.permute.xlu0 %2506 }
 0x42f   : > { %v2068_v4 = vpop.f32.mrf.mxu2  ;;  %v2292_v29 = vpop.f32.mrf.mxu3 }
 0x430   : > { %v2293_v25 = vadd.f32 %v4263_v13, %v2292_v29  ;;  %v2069_v36 = vadd.f32 %v4136_v10, %v2068_v4  ;;  %v2523_v4 = vpop.permute.xlu2 %2522 }
 0x432   : > { %v2642_v56 = vsel %vm516_vm0, %v2293_v25, %v2495_v43 }
 0x433   : > { %2706 = vst [vmem:[%s4275_s25 + $0x160] sm:$0xff] %v2642_v56 }
 0x434   : > { %v2521_v3 = vpop.permute.xlu1 %2520 }
 0x435   : > { %v2513_v15 = vpop.permute.xlu0 %2512 }
 0x437   : > { %v2070_v12 = vpop.f32.mrf.mxu2  ;;  %v2294_v34 = vpop.f32.mrf.mxu3 }
 0x438   : > { %v2071_v20 = vadd.f32 %v4136_v10, %v2070_v12  ;;  %v2295_v37 = vadd.f32 %v4263_v13, %v2294_v34 }
 0x43a   : > { %v2104_v42 = vpack.c.bf16 %v2071_v20, %v2069_v36  ;;  %v2643_v44 = vsel %vm516_vm0, %v2295_v37, %v2497_v38 }
 0x43b   : > { %2707 = vst [vmem:[%s4275_s25 + $0x168] sm:$0xff] %v2643_v44  ;;  %v2529_v44 = vpop.permute.xlu2 %2528 }
 0x43c   : > { %2336 = vmatmul.bf16.gmra.mxu3 %v2104_v42  ;;  %v2527_v20 = vpop.permute.xlu1 %2526 }
 0x43d   : > { %v2519_v57 = vpop.permute.xlu0 %2518 }
 0x43f   : > { %v2297_v35 = vpop.f32.mrf.mxu3 }
 0x440   : > { %v2298_v31 = vadd.f32 %v4263_v13, %v2297_v35 }
 0x442   : > { %v2644_v11 = vsel %vm516_vm0, %v2298_v31, %v2499_v1 }
 0x443   : > { %2708 = vst [vmem:[%s4275_s25 + $0x170] sm:$0xff] %v2644_v11 }
 0x445   : > { %v2525_v56 = vpop.permute.xlu0 %2524 }
 0x447   : > { %v2299_v40 = vpop.f32.mrf.mxu3 }
 0x448   : > { %v2300_v10 = vadd.f32 %v4263_v13, %v2299_v40 }
 0x44a   : > { %v2645_v8 = vsel %vm516_vm0, %v2300_v10, %v2501_v59 }
 0x44b   : > { %2709 = vst [vmem:[%s4275_s25 + $0x178] sm:$0xff] %v2645_v8  ;;  %v2533_v8 = vpop.permute.xlu1 %2532 }
 0x44d   : > { %v2531_v11 = vpop.permute.xlu0 %2530 }
 0x44f   : > { %v2302_v5 = vpop.f32.mrf.mxu3 }
 0x450   : > { %v2303_v52 = vadd.f32 %v4263_v13, %v2302_v5 }
 0x452   : > { %v2646_v6 = vsel %vm516_vm0, %v2303_v52, %v2503_v61 }
 0x453   : > { %2710 = vst [vmem:[%s4275_s25 + $0x180] sm:$0xff] %v2646_v6 }
 0x457   : > { %v2304_v19 = vpop.f32.mrf.mxu3 }
 0x458   : > { %v2305_v9 = vadd.f32 %v4263_v13, %v2304_v19 }
 0x45a   : > { %v2647_v2 = vsel %vm516_vm0, %v2305_v9, %v2505_v53 }
 0x45b   : > { %2711 = vst [vmem:[%s4275_s25 + $0x188] sm:$0xff] %v2647_v2 }
 0x45f   : > { %v2307_v41 = vpop.f32.mrf.mxu3 }
 0x460   : > { %v2308_v28 = vadd.f32 %v4263_v13, %v2307_v41 }
 0x462   : > { %v2648_v48 = vsel %vm516_vm0, %v2308_v28, %v2507_v30 }
 0x463   : > { %2712 = vst [vmem:[%s4275_s25 + $0x190] sm:$0xff] %v2648_v48 }
 0x467   : > { %v2309_v16 = vpop.f32.mrf.mxu3 }
 0x468   : > { %v2310_v14 = vadd.f32 %v4263_v13, %v2309_v16 }
 0x46a   : > { %v2649_v21 = vsel %vm516_vm0, %v2310_v14, %v2509_v18 }
 0x46b   : > { %2713 = vst [vmem:[%s4275_s25 + $0x198] sm:$0xff] %v2649_v21 }
 0x46f   : > { %v2312_v23 = vpop.f32.mrf.mxu3 }
 0x470   : > { %v2313_v63 = vadd.f32 %v4263_v13, %v2312_v23 }
 0x472   : > { %v2650_v49 = vsel %vm516_vm0, %v2313_v63, %v2511_v46 }
 0x473   : > { %2714 = vst [vmem:[%s4275_s25 + $0x1a0] sm:$0xff] %v2650_v49 }
 0x477   : > { %v2314_v51 = vpop.f32.mrf.mxu3 }
 0x478   : > { %v2315_v62 = vadd.f32 %v4263_v13, %v2314_v51 }
 0x47a   : > { %v2651_v47 = vsel %vm516_vm0, %v2315_v62, %v2513_v15 }
 0x47b   : > { %2715 = vst [vmem:[%s4275_s25 + $0x1a8] sm:$0xff] %v2651_v47 }
 0x47f   : > { %v2317_v45 = vpop.f32.mrf.mxu3 }
 0x480   : > { %v2318_v26 = vadd.f32 %v4263_v13, %v2317_v45 }
 0x482   : > { %v2652_v39 = vsel %vm516_vm0, %v2318_v26, %v2515_v32 }
 0x483   : > { %2716 = vst [vmem:[%s4275_s25 + $0x1b0] sm:$0xff] %v2652_v39 }
 0x487   : > { %v2319_v17 = vpop.f32.mrf.mxu3 }
 0x488   : > { %v2320_v24 = vadd.f32 %v4263_v13, %v2319_v17 }
 0x48a   : > { %v2653_v27 = vsel %vm516_vm0, %v2320_v24, %v2517_v58 }
 0x48b   : > { %2717 = vst [vmem:[%s4275_s25 + $0x1b8] sm:$0xff] %v2653_v27 }
 0x48f   : > { %v2322_v54 = vpop.f32.mrf.mxu3 }
 0x490   : > { %v2323_v55 = vadd.f32 %v4263_v13, %v2322_v54 }
 0x492   : > { %v2654_v33 = vsel %vm516_vm0, %v2323_v55, %v2519_v57 }
 0x493   : > { %2718 = vst [vmem:[%s4275_s25 + $0x1c0] sm:$0xff] %v2654_v33 }
 0x497   : > { %v2324_v50 = vpop.f32.mrf.mxu3 }
 0x498   : > { %v2325_v22 = vadd.f32 %v4263_v13, %v2324_v50 }
 0x49a   : > { %v2655_v60 = vsel %vm516_vm0, %v2325_v22, %v2521_v3 }
 0x49b   : > { %2719 = vst [vmem:[%s4275_s25 + $0x1c8] sm:$0xff] %v2655_v60 }
 0x49f   : > { %v2327_v0 = vpop.f32.mrf.mxu3 }
 0x4a0   : > { %v2328_v7 = vadd.f32 %v4263_v13, %v2327_v0 }
 0x4a2   : > { %v2656_v29 = vsel %vm516_vm0, %v2328_v7, %v2523_v4 }
 0x4a3   : > { %2720 = vst [vmem:[%s4275_s25 + $0x1d0] sm:$0xff] %v2656_v29 }
 0x4a7   : > { %v2329_v25 = vpop.f32.mrf.mxu3 }
 0x4a8   : > { %v2330_v43 = vadd.f32 %v4263_v13, %v2329_v25 }
 0x4aa   : > { %v2657_v12 = vsel %vm516_vm0, %v2330_v43, %v2525_v56 }
 0x4ab   : > { %2721 = vst [vmem:[%s4275_s25 + $0x1d8] sm:$0xff] %v2657_v12 }
 0x4af   : > { %v2332_v34 = vpop.f32.mrf.mxu3 }
 0x4b0   : > { %v2333_v36 = vadd.f32 %v4263_v13, %v2332_v34 }
 0x4b2   : > { %v2658_v37 = vsel %vm516_vm0, %v2333_v36, %v2527_v20 }
 0x4b3   : > { %2722 = vst [vmem:[%s4275_s25 + $0x1e0] sm:$0xff] %v2658_v37 }
 0x4b7   : > { %v2334_v38 = vpop.f32.mrf.mxu3 }
 0x4b8   : > { %v2335_v42 = vadd.f32 %v4263_v13, %v2334_v38 }
 0x4ba   : > { %v2659_v35 = vsel %vm516_vm0, %v2335_v42, %v2529_v44 }
 0x4bb   : > { %2723 = vst [vmem:[%s4275_s25 + $0x1e8] sm:$0xff] %v2659_v35 }
 0x4bf   : > { %v2337_v31 = vpop.f32.mrf.mxu3 }
 0x4c0   : > { %v2338_v1 = vadd.f32 %v4263_v13, %v2337_v31 }
 0x4c2   : > { %v2660_v40 = vsel %vm516_vm0, %v2338_v1, %v2531_v11 }
 0x4c3   : > { %2724 = vst [vmem:[%s4275_s25 + $0x1f0] sm:$0xff] %v2660_v40 }
 0x4c7   : > { %v2339_v10 = vpop.f32.mrf.mxu3 }
 0x4c8   : > { %v2340_v59 = vadd.f32 %v4263_v13, %v2339_v10 }
 0x4ca   : > { %v2661_v5 = vsel %vm516_vm0, %v2340_v59, %v2533_v8 }
 0x4cb   : > { %2725 = vst [vmem:[%s4275_s25 + $0x1f8] sm:$0xff] %v2661_v5 }
 0x4cc   : > { %3211 = shalt.err (!%p3208_p3)
}
 0x4cd   : > { %s3250_s18 = smov 128   ;;  %s3251_s25 = smov 8  }
 0x4ce   : > { %3005 = dma.vmem_to_hbm [thread:$0]  (%p3345_p5), %s2740_s29, 8192, %s2742_s11, %s2727_s17, %s3250_s18, %s3250_s18, %s3251_s25  }
 0x4cf PF: > { %p3011_p4 = scmp.ge.s32.totalorder %s3246_s16, 2  ;;  %s2756_s20 = sand.u32 1, %s3234_s13  }
 0x4d0   : > { %s2757_s12 = scalar_lea.sflag [#allocation3], %s2756_s20 }
 0x4d1   : > { %p3008_p7 = pnand %p3011_p4, %p3349_p6 }
 0x4d3   : > { %p3009_p8 = pneg %p3008_p7 }
 0x4d5   : > { %3229 = dma.done.wait (%p3009_p8), %s2757_s12, 8192  }
 0x4d6   : > { %3231 = vsyncadd (%p3009_p8), %s2757_s12, 4294959104  ;;  %p20_p9 = scmp.ge.s32.totalorder %s3332_s19, 4   ;;  %s4727_s13 = smov %s3238_s14 }
 0x4d7   : > { %s4728_s14 = smov %s3242_s15  ;;  %s4729_s15 = smov %s3343_s22 }
 0x4d8   : > { %s4730_s16 = smov %s3332_s19  ;;  %22 = sbr.rel (!%p20_p9) target bundleno = 3 (0x3), region = 98 }
 0x4dd   :  { %2763 = vsyncpa [#allocation3], 1 }
 0x4de   :  { %2765 = vsyncpa [#allocation3 + $0x1], 1 }

</bundles_post_ra>
